<compile_context>
chip_gen: v7x
topology: tpu7x:2x2x1
jax: 0.10.0
libtpu: 0.0.40
codegen_flags: <defaults>
</compile_context>

<pallas_src>
import functools
import math

import numpy as np
import jax
import jax.numpy as jnp
from jax import lax
from jax.experimental import pallas as pl
from jax.experimental.pallas import tpu as pltpu


# ----------------------------------------------------------------------------
# Fused Pallas kernel: SA-attn + CA-attn + concat + 1x1conv/BN/ReLU
# ----------------------------------------------------------------------------
def fused_mfa_kernel(sal_ref, edge_ref, wsal_ref, wedge_ref, bq_ref,
                     wo_ref, bo_ref, bias_ref, out_ref, o_scratch,
                     *, num_heads_total, head_dim, batch, n_tok):
    """Single-step kernel, batch packed onto the lane axis (B*N lanes).

    sal_ref  : (B*N, C)    f32  token-major sal features (free reshape of input)
    edge_ref : (C/2, B*N)  f32  channel-major edge features
    wsal_ref : (3C, C)     bf16 stacked [q;k;v] weights applied to sal channels
    wedge_ref: (3C, C/2)   bf16 stacked weights applied to edge (CA-q rows only)
    bq_ref   : (C, 1)      f32  query bias (scale folded); bk/bv eliminated
    wo_ref   : (C, C)      bf16 folded Wo_sa/Wo_ca + 1x1 conv + BN scale
    bo_ref   : (C, 1)      f32  folded bv + Wo bias + conv bias + BN shift
    bias_ref : (2*nh, B*N, B*N) bf16  RPB + KxK mask + cross-batch -1e9
    out_ref  : (B, C, N)   f32
    o_scratch: (C, B*N)    f32  VMEM head-output accumulator
    """
    f32 = jnp.float32
    bf16 = jnp.bfloat16
    C = num_heads_total * head_dim

    # bf16 casts happen here (cheap VPU work) instead of as wrapper HBM passes.
    sal_bf = sal_ref[...].astype(bf16)       # (B*N, C)
    edge_bf = edge_ref[...].astype(bf16)     # (C/2, B*N)

    # Fused QKV projection, channel-major result rows = [q(C); k(C); v(C)].
    # sal contributes via a transposed contraction (contract channel axes of
    # both operands) -> no activation transpose is ever materialized; the edge
    # tensor only feeds the CA-query rows (other rows of wedge are zero).
    qkvT = lax.dot_general(wsal_ref[...], sal_bf, (((1,), (1,)), ((), ())),
                           preferred_element_type=f32)            # (3C, B*N)
    qkvT = qkvT + jnp.dot(wedge_ref[...], edge_bf, preferred_element_type=f32)

    qT = qkvT[0:C, :] + bq_ref[...]   # bk dropped: softmax shift-invariance (exact)
    kT = qkvT[C:2 * C, :]             # bv folded into bo offline (rows of P sum to 1)
    vT = qkvT[2 * C:3 * C, :]

    for g in range(num_heads_total):            # static tiny loop (4 heads)
        r0 = g * head_dim
        qg = qT[r0:r0 + head_dim, :]             # (dh, B*N) f32, sublane-aligned
        kg = kT[r0:r0 + head_dim, :]
        vg = vT[r0:r0 + head_dim, :]

        # scores: contract head_dim rows of q and k -> (B*N, B*N), full 128 lanes
        s = lax.dot_general(qg, kg, (((0,), (0,)), ((), ())),
                            preferred_element_type=f32)
        s = s + bias_ref[g].astype(f32)          # RPB + window mask + batch mask
        s = s - jnp.max(s, axis=-1, keepdims=True)
        e = jnp.exp(s)
        p = e * pl.reciprocal(jnp.sum(e, axis=-1, keepdims=True), approx=True)

        # o^T = v^T @ p^T, written straight into this head's sublane range
        o_scratch[r0:r0 + head_dim, :] = lax.dot_general(
            vg.astype(bf16), p.astype(bf16), (((1,), (1,)), ((), ())),
            preferred_element_type=f32)

    # folded Wo + 1x1 conv + BatchNorm, then ReLU
    y = jnp.dot(wo_ref[...], o_scratch[...].astype(bf16),
                preferred_element_type=f32) + bo_ref[...]
    y = jnp.maximum(y, 0.0)

    # Unpack the lane-packed batch so the wrapper only needs a free reshape to
    # NCHW (cheaper than an extra XLA transpose op at this size).
    for b in range(batch):
        out_ref[b] = y[:, b * n_tok:(b + 1) * n_tok]


# ----------------------------------------------------------------------------
# pallas_call wrapper
# ----------------------------------------------------------------------------
def fused_mfa(sal_tm, edge_cm, p, num_heads_total, batch, n_tok):
    BN, C = sal_tm.shape
    half = C // 2
    head_dim = C // num_heads_total
    kern = functools.partial(fused_mfa_kernel,
                             num_heads_total=num_heads_total,
                             head_dim=head_dim, batch=batch, n_tok=n_tok)
    full2 = lambda i: (0, 0)
    # Single grid step: the whole batch lives in the 128 lanes.
    # TODO(synk): for batch > 2 (or large HW) use grid=(B // per_step,) with
    # dimension_semantics=("parallel",) so v7x's two TensorCores both get work.
    return pl.pallas_call(
        kern,
        out_shape=jax.ShapeDtypeStruct((batch, C, n_tok), jnp.float32),
        grid=(1,),
        in_specs=[
            pl.BlockSpec((BN, C), full2),                     # sal (token-major)
            pl.BlockSpec((half, BN), full2),                  # edge (channel-major)
            pl.BlockSpec((3 * C, C), full2),                  # stacked QKV (sal)
            pl.BlockSpec((3 * C, half), full2),               # stacked QKV (edge)
            pl.BlockSpec((C, 1), full2),                      # bq
            pl.BlockSpec((C, C), full2),                      # folded Wo/conv/BN
            pl.BlockSpec((C, 1), full2),                      # folded bias
            pl.BlockSpec((num_heads_total, BN, BN), lambda i: (0, 0, 0)),  # NAT bias
        ],
        out_specs=pl.BlockSpec((batch, C, n_tok), lambda i: (0, 0, 0)),
        scratch_shapes=[pltpu.VMEM((C, BN), jnp.float32)],
        compiler_params=pltpu.CompilerParams(
            dimension_semantics=("arbitrary",)),
    )(sal_tm, edge_cm, p["w_sal"], p["w_edge"], p["bq"], p["wo"], p["bo"],
      p["bias"])


def mixed_frequency_attention(sal_feat, edge_feat, fused, num_heads):
    """sal_feat: (B, H*W, C) tokens; edge_feat: (B, C//2, H, W) NCHW.
    Returns (B, C, H, W) like the PyTorch module."""
    B, N, C = sal_feat.shape
    H = int(round(math.sqrt(N))); W = H
    half = C // 2
    # Pack the batch onto the lane axis. The sal path is a FREE metadata-only
    # reshape; only the small edge path needs one relayout op.
    sal_tm = sal_feat.reshape(B * N, C)
    edge_cm = jnp.transpose(edge_feat.reshape(B, half, N),
                            (1, 0, 2)).reshape(half, B * N)
    out = fused_mfa(sal_tm, edge_cm, fused, 2 * num_heads, B, N)  # (B, C, N)
    return out.reshape(B, C, H, W)                                # free reshape


# ----------------------------------------------------------------------------
# Glue: neighborhood mask + RPB, parameter init, offline parameter folding
# ----------------------------------------------------------------------------
def build_nat_bias(H, W, K, rpb):
    """bias[h, q, p] = rpb at relative offset, or -1e9 outside the K x K
    clamped neighborhood (NATTEN boundary handling). Returns np.float32."""
    r = K // 2
    i = np.arange(H); si = np.clip(i - r, 0, H - K)
    j = np.arange(W); sj = np.clip(j - r, 0, W - K)
    ki = np.arange(H); kj = np.arange(W)
    row_in = (ki[None, :] >= si[:, None]) & (ki[None, :] < si[:, None] + K)  # (H,H)
    col_in = (kj[None, :] >= sj[:, None]) & (kj[None, :] < sj[:, None] + K)  # (W,W)
    ridx = np.clip(ki[None, :] - i[:, None] + K - 1, 0, 2 * K - 2)           # (H,H)
    cidx = np.clip(kj[None, :] - j[:, None] + K - 1, 0, 2 * K - 2)           # (W,W)
    rpb = np.asarray(rpb, np.float32)
    rpb_g = rpb[:, ridx[:, None, :, None], cidx[None, :, None, :]]  # (nh,H,W,H,W)
    in_nb = row_in[:, None, :, None] & col_in[None, :, None, :]     # (H,W,H,W)
    bias = np.where(in_nb[None], rpb_g, -1e9).astype(np.float32)
    return bias.reshape(rpb.shape[0], H * W, H * W)


def build_packed_bias(H, W, K, rpb, batch):
    """Block-diagonal batch-packed bias: (nh, B*N, B*N) with -1e9 between batches."""
    base = build_nat_bias(H, W, K, rpb)                 # (nh, N, N)
    nh, N, _ = base.shape
    out = np.full((nh, batch * N, batch * N), -1e9, np.float32)
    for b in range(batch):
        out[:, b * N:(b + 1) * N, b * N:(b + 1) * N] = base
    return out


def init_nat_params(key, dim, num_heads, kernel_size, scale=0.2):
    ks = jax.random.split(key, 9)
    def lin(kw, kb):
        return (jax.random.normal(kw, (dim, dim), jnp.float32) * scale,
                jax.random.normal(kb, (1, dim), jnp.float32) * scale)
    wq, bq = lin(ks[0], ks[1]); wk, bk = lin(ks[2], ks[3])
    wv, bv = lin(ks[4], ks[5]); wo, bo = lin(ks[6], ks[7])
    rpb = np.asarray(jax.random.normal(
        ks[8], (num_heads, 2 * kernel_size - 1, 2 * kernel_size - 1),
        jnp.float32)) * scale
    return dict(wq=wq, bq=bq, wk=wk, bk=bk, wv=wv, bv=bv, wo=wo, bo=bo), rpb


def init_converge_params(key, C, scale=0.2, eps=1e-5):
    ks = jax.random.split(key, 6)
    w = jax.random.normal(ks[0], (C, C), jnp.float32) * scale      # (Cout, Cin)
    b = jax.random.normal(ks[1], (1, C), jnp.float32) * scale
    gamma = 1.0 + 0.1 * jax.random.normal(ks[2], (1, C), jnp.float32)
    beta = 0.1 * jax.random.normal(ks[3], (1, C), jnp.float32)
    mean = 0.1 * jax.random.normal(ks[4], (1, C), jnp.float32)
    var = jnp.abs(jax.random.normal(ks[5], (1, C), jnp.float32)) + 0.5
    bn_scale = gamma / jnp.sqrt(var + eps)
    bn_shift = beta - mean * bn_scale
    return dict(w=w, b=b, bn_scale=bn_scale, bn_shift=bn_shift)


def fold_params(sa_p, sa_rpb, ca_p, ca_rpb, conv_p, H, W, sa_kernel, ca_kernel,
                num_heads, batch):
    """Build the fused-kernel parameters from the module-style parameters."""
    half = sa_p["wq"].shape[0]
    C = 2 * half
    head_dim = half // num_heads
    qscale = 1.0 / math.sqrt(head_dim)
    bf16 = jnp.bfloat16

    def npT(x):
        return np.asarray(x, np.float32).T          # token-major w -> channel-major w^T

    # Stacked QKV weight applied to sal channels; rows = [q(C); k(C); v(C)].
    w_sal = np.zeros((3 * C, C), np.float32)
    w_sal[0:half, 0:half] = qscale * npT(sa_p["wq"])           # SA-q <- sal_low
    # CA-q rows (half:C) come from the edge tensor (w_edge below).
    w_sal[C:C + half, 0:half] = npT(sa_p["wk"])                # SA-k <- sal_low
    w_sal[C + half:2 * C, half:C] = npT(ca_p["wk"])            # CA-k <- sal_high
    w_sal[2 * C:2 * C + half, 0:half] = npT(sa_p["wv"])        # SA-v <- sal_low
    w_sal[2 * C + half:3 * C, half:C] = npT(ca_p["wv"])        # CA-v <- sal_high

    w_edge = np.zeros((3 * C, half), np.float32)
    w_edge[half:C, :] = qscale * npT(ca_p["wq"])               # CA-q <- edge

    bq = qscale * np.concatenate(
        [np.asarray(sa_p["bq"]), np.asarray(ca_p["bq"])], axis=1).reshape(C, 1)
    bv_cat = np.concatenate(
        [np.asarray(sa_p["bv"]), np.asarray(ca_p["bv"])], axis=1).reshape(C, 1)
    bo_cat = np.concatenate(
        [np.asarray(sa_p["bo"]), np.asarray(ca_p["bo"])], axis=1).reshape(C, 1)

    # out^T = ReLU( bn_scale*(Wconv @ (Wo_bd^T @ (O^T + bv) + bo) + b_conv) + bn_shift )
    z = np.zeros((half, half), np.float32)
    woT_bd = np.block([[npT(sa_p["wo"]), z], [z, npT(ca_p["wo"])]])   # (C, C)
    bn_scale = np.asarray(conv_p["bn_scale"], np.float32).reshape(C, 1)
    bn_shift = np.asarray(conv_p["bn_shift"], np.float32).reshape(C, 1)
    b_conv = np.asarray(conv_p["b"], np.float32).reshape(C, 1)
    w_conv = np.asarray(conv_p["w"], np.float32)
    w_final = bn_scale * (w_conv @ woT_bd)                            # (C, C)
    b_final = bn_scale * (w_conv @ (woT_bd @ bv_cat + bo_cat) + b_conv) + bn_shift

    bias = np.concatenate(
        [build_packed_bias(H, W, sa_kernel, sa_rpb, batch),
         build_packed_bias(H, W, ca_kernel, ca_rpb, batch)], axis=0)  # (2nh, BN, BN)

    return dict(w_sal=jnp.asarray(w_sal).astype(bf16),
                w_edge=jnp.asarray(w_edge).astype(bf16),
                bq=jnp.asarray(bq),
                wo=jnp.asarray(w_final).astype(bf16),
                bo=jnp.asarray(b_final),
                bias=jnp.asarray(bias).astype(bf16))


# ----------------------------------------------------------------------------
# Pure-JAX reference (module-style math, f32) for the correctness check
# ----------------------------------------------------------------------------
def nat_reference(xq, xkv, p, bias, num_heads):
    B, HW, D = xq.shape
    dh = D // num_heads
    q = xq @ p["wq"] + p["bq"]
    k = xkv @ p["wk"] + p["bk"]
    v = xkv @ p["wv"] + p["bv"]
    q = q.reshape(B, HW, num_heads, dh) * (1.0 / math.sqrt(dh))
    k = k.reshape(B, HW, num_heads, dh)
    v = v.reshape(B, HW, num_heads, dh)
    s = jnp.einsum("bnhd,bmhd->bhnm", q, k) + bias[None]
    a = jax.nn.softmax(s, axis=-1)
    o = jnp.einsum("bhnm,bmhd->bnhd", a, v).reshape(B, HW, D)
    return o @ p["wo"] + p["bo"]


def reference_forward(sal_feat, edge_feat, raw, num_heads):
    B, N, C = sal_feat.shape
    H = int(round(math.sqrt(N))); W = H
    half = C // 2
    edge_tok = jnp.transpose(edge_feat, (0, 2, 3, 1)).reshape(B, N, half)
    attn_sa = nat_reference(sal_feat[:, :, :half], sal_feat[:, :, :half],
                            raw["sa"], raw["sa_bias"], num_heads)
    attn_ca = nat_reference(edge_tok, sal_feat[:, :, half:],
                            raw["ca"], raw["ca_bias"], num_heads)
    refine = jnp.concatenate([attn_sa, attn_ca], axis=-1)
    cp = raw["conv"]
    y = refine @ cp["w"].T + cp["b"]
    y = y * cp["bn_scale"] + cp["bn_shift"]
    y = jnp.maximum(y, 0.0)
    return jnp.transpose(y.reshape(B, H, W, C), (0, 3, 1, 2))


# ----------------------------------------------------------------------------
if __name__ == "__main__":
    # config: hidden_size=32, num_heads=2, kernel_size_sa=3, kernel_size_ca=5
    B, H, W, C = 2, 8, 8, 32
    num_heads, sa_kernel, ca_kernel = 2, 3, 5
    N, half = H * W, C // 2

    key = jax.random.PRNGKey(0)
    k_sal, k_edge, k_sa, k_ca, k_conv = jax.random.split(key, 5)

    sal_feat = jax.random.normal(k_sal, (B, N, C), jnp.float32)
    edge_feat = jax.random.normal(k_edge, (B, half, H, W), jnp.float32)

    sa_p, sa_rpb = init_nat_params(k_sa, half, num_heads, sa_kernel)
    ca_p, ca_rpb = init_nat_params(k_ca, half, num_heads, ca_kernel)
    conv_p = init_converge_params(k_conv, C)

    fused = fold_params(sa_p, sa_rpb, ca_p, ca_rpb, conv_p, H, W,
                        sa_kernel, ca_kernel, num_heads, B)

    fwd = jax.jit(functools.partial(mixed_frequency_attention,
                                    num_heads=num_heads))
    out = jax.block_until_ready(fwd(sal_feat, edge_feat, fused))

    raw = dict(sa=sa_p, ca=ca_p, conv=conv_p,
               sa_bias=jnp.asarray(build_nat_bias(H, W, sa_kernel, sa_rpb)),
               ca_bias=jnp.asarray(build_nat_bias(H, W, ca_kernel, ca_rpb)))
    ref = jax.block_until_ready(
        reference_forward(sal_feat, edge_feat, raw, num_heads))

    assert out.shape == (B, C, H, W), out.shape
    # tolerance covers intentional bf16 MXU operands / bf16 bias table,
    # approx-reciprocal softmax and offline parameter folding
    np.testing.assert_allclose(np.asarray(out), np.asarray(ref),
                               rtol=3e-2, atol=3e-2)
    print("KERNEL_OK")
</pallas_src>

<mosaic_0001>
module attributes {stable_mosaic.version = 11 : i64} {
  func.func @fused_mfa_kernel(%arg0: i32, %arg1: memref<128x32xf32, #tpu.memory_space<vmem>>, %arg2: memref<16x128xf32, #tpu.memory_space<vmem>>, %arg3: memref<96x32xbf16, #tpu.memory_space<vmem>>, %arg4: memref<96x16xbf16, #tpu.memory_space<vmem>>, %arg5: memref<32x1xf32, #tpu.memory_space<vmem>>, %arg6: memref<32x32xbf16, #tpu.memory_space<vmem>>, %arg7: memref<32x1xf32, #tpu.memory_space<vmem>>, %arg8: memref<4x128x128xbf16, #tpu.memory_space<vmem>>, %arg9: memref<2x32x64xf32, #tpu.memory_space<vmem>>, %arg10: memref<32x128xf32, #tpu.memory_space<vmem>>) attributes {dimension_semantics = [#tpu.dimension_semantics<arbitrary>], iteration_bounds = array<i64: 1>, scalar_prefetch = 0 : i64, scratch_operands = 1 : i64, tpu.core_type = #tpu.core_type<tc>, window_params = [{pipeline_mode = #tpu.pipeline_mode<synchronous>, transform_indices = @transform_0, window_bounds = array<i64: 128, 32>}, {pipeline_mode = #tpu.pipeline_mode<synchronous>, transform_indices = @transform_1, window_bounds = array<i64: 16, 128>}, {pipeline_mode = #tpu.pipeline_mode<synchronous>, transform_indices = @transform_2, window_bounds = array<i64: 96, 32>}, {pipeline_mode = #tpu.pipeline_mode<synchronous>, transform_indices = @transform_3, window_bounds = array<i64: 96, 16>}, {pipeline_mode = #tpu.pipeline_mode<synchronous>, transform_indices = @transform_4, window_bounds = array<i64: 32, 1>}, {pipeline_mode = #tpu.pipeline_mode<synchronous>, transform_indices = @transform_5, window_bounds = array<i64: 32, 32>}, {pipeline_mode = #tpu.pipeline_mode<synchronous>, transform_indices = @transform_6, window_bounds = array<i64: 32, 1>}, {pipeline_mode = #tpu.pipeline_mode<synchronous>, transform_indices = @transform_7, window_bounds = array<i64: 4, 128, 128>}, {pipeline_mode = #tpu.pipeline_mode<synchronous>, transform_indices = @transform_8, window_bounds = array<i64: 2, 32, 64>}]} {
    %c0 = arith.constant 0 : index
    %c0_0 = arith.constant 0 : index
    %0 = vector.load %arg1[%c0, %c0_0] : memref<128x32xf32, #tpu.memory_space<vmem>>, vector<128x32xf32>
    %1 = arith.truncf %0 : vector<128x32xf32> to vector<128x32xbf16>
    %c0_1 = arith.constant 0 : index
    %c0_2 = arith.constant 0 : index
    %2 = vector.load %arg2[%c0_1, %c0_2] : memref<16x128xf32, #tpu.memory_space<vmem>>, vector<16x128xf32>
    %3 = arith.truncf %2 : vector<16x128xf32> to vector<16x128xbf16>
    %c0_3 = arith.constant 0 : index
    %c0_4 = arith.constant 0 : index
    %4 = vector.load %arg3[%c0_3, %c0_4] : memref<96x32xbf16, #tpu.memory_space<vmem>>, vector<96x32xbf16>
    %cst = arith.constant dense<0.000000e+00> : vector<96x128xf32>
    %5 = tpu.matmul %4, %1, %cst {dimension_numbers = #tpu.dot_dimension_numbers<[1], [1], [0], [0], [0, 0, 1, 0], [], []>} : vector<96x32xbf16>, vector<128x32xbf16>, vector<96x128xf32> -> vector<96x128xf32>
    %c0_5 = arith.constant 0 : index
    %c0_6 = arith.constant 0 : index
    %6 = vector.load %arg4[%c0_5, %c0_6] : memref<96x16xbf16, #tpu.memory_space<vmem>>, vector<96x16xbf16>
    %cst_7 = arith.constant dense<0.000000e+00> : vector<96x128xf32>
    %7 = tpu.matmul %6, %3, %cst_7 {dimension_numbers = #tpu.dot_dimension_numbers<[1], [0], [0], [1], [0, 0, 1, 1], [], []>} : vector<96x16xbf16>, vector<16x128xbf16>, vector<96x128xf32> -> vector<96x128xf32>
    %8 = arith.addf %5, %7 : vector<96x128xf32>
    %9 = vector.extract_strided_slice %8 {offsets = [0, 0], sizes = [32, 128], strides = [1, 1]} : vector<96x128xf32> to vector<32x128xf32>
    %c0_8 = arith.constant 0 : index
    %c0_9 = arith.constant 0 : index
    %10 = vector.load %arg5[%c0_8, %c0_9] : memref<32x1xf32, #tpu.memory_space<vmem>>, vector<32x1xf32>
    %11 = vector.broadcast %10 : vector<32x1xf32> to vector<32x128xf32>
    %12 = arith.addf %9, %11 : vector<32x128xf32>
    %13 = vector.extract_strided_slice %8 {offsets = [32, 0], sizes = [32, 128], strides = [1, 1]} : vector<96x128xf32> to vector<32x128xf32>
    %14 = vector.extract_strided_slice %8 {offsets = [64, 0], sizes = [32, 128], strides = [1, 1]} : vector<96x128xf32> to vector<32x128xf32>
    %15 = vector.extract_strided_slice %12 {offsets = [0, 0], sizes = [8, 128], strides = [1, 1]} : vector<32x128xf32> to vector<8x128xf32>
    %16 = vector.extract_strided_slice %13 {offsets = [0, 0], sizes = [8, 128], strides = [1, 1]} : vector<32x128xf32> to vector<8x128xf32>
    %17 = vector.extract_strided_slice %14 {offsets = [0, 0], sizes = [8, 128], strides = [1, 1]} : vector<32x128xf32> to vector<8x128xf32>
    %cst_10 = arith.constant dense<0.000000e+00> : vector<128x128xf32>
    %18 = tpu.matmul %15, %16, %cst_10 {dimension_numbers = #tpu.dot_dimension_numbers<[0], [0], [1], [1], [0, 1, 1, 1], [], []>} : vector<8x128xf32>, vector<8x128xf32>, vector<128x128xf32> -> vector<128x128xf32>
    %c0_11 = arith.constant 0 : index
    %c0_12 = arith.constant 0 : index
    %c0_13 = arith.constant 0 : index
    %19 = vector.load %arg8[%c0_11, %c0_12, %c0_13] : memref<4x128x128xbf16, #tpu.memory_space<vmem>>, vector<1x128x128xbf16>
    %20 = vector.shape_cast %19 : vector<1x128x128xbf16> to vector<128x128xbf16>
    %21 = arith.extf %20 : vector<128x128xbf16> to vector<128x128xf32>
    %22 = arith.addf %18, %21 : vector<128x128xf32>
    %cst_14 = arith.constant dense<0xFF800000> : vector<128xf32>
    %23 = vector.multi_reduction <maximumf>, %22, %cst_14 [1] : vector<128x128xf32> to vector<128xf32>
    %24 = vector.shape_cast %23 : vector<128xf32> to vector<128x1xf32>
    %25 = vector.broadcast %24 : vector<128x1xf32> to vector<128x128xf32>
    %26 = arith.subf %22, %25 : vector<128x128xf32>
    %27 = math.exp %26 : vector<128x128xf32>
    %cst_15 = arith.constant dense<0.000000e+00> : vector<128xf32>
    %28 = vector.multi_reduction <add>, %27, %cst_15 [1] : vector<128x128xf32> to vector<128xf32>
    %29 = vector.shape_cast %28 : vector<128xf32> to vector<128x1xf32>
    %30 = tpu.reciprocal %29 {approx = true} : vector<128x1xf32> -> vector<128x1xf32>
    %31 = vector.broadcast %30 : vector<128x1xf32> to vector<128x128xf32>
    %32 = arith.mulf %27, %31 : vector<128x128xf32>
    %33 = arith.truncf %17 : vector<8x128xf32> to vector<8x128xbf16>
    %34 = arith.truncf %32 : vector<128x128xf32> to vector<128x128xbf16>
    %cst_16 = arith.constant dense<0.000000e+00> : vector<8x128xf32>
    %35 = tpu.matmul %33, %34, %cst_16 {dimension_numbers = #tpu.dot_dimension_numbers<[1], [1], [0], [0], [0, 0, 1, 0], [], []>} : vector<8x128xbf16>, vector<128x128xbf16>, vector<8x128xf32> -> vector<8x128xf32>
    %c0_17 = arith.constant 0 : index
    %c0_18 = arith.constant 0 : index
    %36 = vector.load %arg10[%c0_17, %c0_18] : memref<32x128xf32, #tpu.memory_space<vmem>>, vector<8x128xf32>
    tpu.vector_store %arg10[%c0_17, %c0_18], %35 {strides = array<i32>} : memref<32x128xf32, #tpu.memory_space<vmem>>, vector<8x128xf32>,
    %37 = vector.extract_strided_slice %12 {offsets = [8, 0], sizes = [8, 128], strides = [1, 1]} : vector<32x128xf32> to vector<8x128xf32>
    %38 = vector.extract_strided_slice %13 {offsets = [8, 0], sizes = [8, 128], strides = [1, 1]} : vector<32x128xf32> to vector<8x128xf32>
    %39 = vector.extract_strided_slice %14 {offsets = [8, 0], sizes = [8, 128], strides = [1, 1]} : vector<32x128xf32> to vector<8x128xf32>
    %cst_19 = arith.constant dense<0.000000e+00> : vector<128x128xf32>
    %40 = tpu.matmul %37, %38, %cst_19 {dimension_numbers = #tpu.dot_dimension_numbers<[0], [0], [1], [1], [0, 1, 1, 1], [], []>} : vector<8x128xf32>, vector<8x128xf32>, vector<128x128xf32> -> vector<128x128xf32>
    %c1 = arith.constant 1 : index
    %c0_20 = arith.constant 0 : index
    %c0_21 = arith.constant 0 : index
    %41 = vector.load %arg8[%c1, %c0_20, %c0_21] : memref<4x128x128xbf16, #tpu.memory_space<vmem>>, vector<1x128x128xbf16>
    %42 = vector.shape_cast %41 : vector<1x128x128xbf16> to vector<128x128xbf16>
    %43 = arith.extf %42 : vector<128x128xbf16> to vector<128x128xf32>
    %44 = arith.addf %40, %43 : vector<128x128xf32>
    %cst_22 = arith.constant dense<0xFF800000> : vector<128xf32>
    %45 = vector.multi_reduction <maximumf>, %44, %cst_22 [1] : vector<128x128xf32> to vector<128xf32>
    %46 = vector.shape_cast %45 : vector<128xf32> to vector<128x1xf32>
    %47 = vector.broadcast %46 : vector<128x1xf32> to vector<128x128xf32>
    %48 = arith.subf %44, %47 : vector<128x128xf32>
    %49 = math.exp %48 : vector<128x128xf32>
    %cst_23 = arith.constant dense<0.000000e+00> : vector<128xf32>
    %50 = vector.multi_reduction <add>, %49, %cst_23 [1] : vector<128x128xf32> to vector<128xf32>
    %51 = vector.shape_cast %50 : vector<128xf32> to vector<128x1xf32>
    %52 = tpu.reciprocal %51 {approx = true} : vector<128x1xf32> -> vector<128x1xf32>
    %53 = vector.broadcast %52 : vector<128x1xf32> to vector<128x128xf32>
    %54 = arith.mulf %49, %53 : vector<128x128xf32>
    %55 = arith.truncf %39 : vector<8x128xf32> to vector<8x128xbf16>
    %56 = arith.truncf %54 : vector<128x128xf32> to vector<128x128xbf16>
    %cst_24 = arith.constant dense<0.000000e+00> : vector<8x128xf32>
    %57 = tpu.matmul %55, %56, %cst_24 {dimension_numbers = #tpu.dot_dimension_numbers<[1], [1], [0], [0], [0, 0, 1, 0], [], []>} : vector<8x128xbf16>, vector<128x128xbf16>, vector<8x128xf32> -> vector<8x128xf32>
    %c8 = arith.constant 8 : index
    %c0_25 = arith.constant 0 : index
    %58 = vector.load %arg10[%c8, %c0_25] : memref<32x128xf32, #tpu.memory_space<vmem>>, vector<8x128xf32>
    tpu.vector_store %arg10[%c8, %c0_25], %57 {strides = array<i32>} : memref<32x128xf32, #tpu.memory_space<vmem>>, vector<8x128xf32>,
    %59 = vector.extract_strided_slice %12 {offsets = [16, 0], sizes = [8, 128], strides = [1, 1]} : vector<32x128xf32> to vector<8x128xf32>
    %60 = vector.extract_strided_slice %13 {offsets = [16, 0], sizes = [8, 128], strides = [1, 1]} : vector<32x128xf32> to vector<8x128xf32>
    %61 = vector.extract_strided_slice %14 {offsets = [16, 0], sizes = [8, 128], strides = [1, 1]} : vector<32x128xf32> to vector<8x128xf32>
    %cst_26 = arith.constant dense<0.000000e+00> : vector<128x128xf32>
    %62 = tpu.matmul %59, %60, %cst_26 {dimension_numbers = #tpu.dot_dimension_numbers<[0], [0], [1], [1], [0, 1, 1, 1], [], []>} : vector<8x128xf32>, vector<8x128xf32>, vector<128x128xf32> -> vector<128x128xf32>
    %c2 = arith.constant 2 : index
    %c0_27 = arith.constant 0 : index
    %c0_28 = arith.constant 0 : index
    %63 = vector.load %arg8[%c2, %c0_27, %c0_28] : memref<4x128x128xbf16, #tpu.memory_space<vmem>>, vector<1x128x128xbf16>
    %64 = vector.shape_cast %63 : vector<1x128x128xbf16> to vector<128x128xbf16>
    %65 = arith.extf %64 : vector<128x128xbf16> to vector<128x128xf32>
    %66 = arith.addf %62, %65 : vector<128x128xf32>
    %cst_29 = arith.constant dense<0xFF800000> : vector<128xf32>
    %67 = vector.multi_reduction <maximumf>, %66, %cst_29 [1] : vector<128x128xf32> to vector<128xf32>
    %68 = vector.shape_cast %67 : vector<128xf32> to vector<128x1xf32>
    %69 = vector.broadcast %68 : vector<128x1xf32> to vector<128x128xf32>
    %70 = arith.subf %66, %69 : vector<128x128xf32>
    %71 = math.exp %70 : vector<128x128xf32>
    %cst_30 = arith.constant dense<0.000000e+00> : vector<128xf32>
    %72 = vector.multi_reduction <add>, %71, %cst_30 [1] : vector<128x128xf32> to vector<128xf32>
    %73 = vector.shape_cast %72 : vector<128xf32> to vector<128x1xf32>
    %74 = tpu.reciprocal %73 {approx = true} : vector<128x1xf32> -> vector<128x1xf32>
    %75 = vector.broadcast %74 : vector<128x1xf32> to vector<128x128xf32>
    %76 = arith.mulf %71, %75 : vector<128x128xf32>
    %77 = arith.truncf %61 : vector<8x128xf32> to vector<8x128xbf16>
    %78 = arith.truncf %76 : vector<128x128xf32> to vector<128x128xbf16>
    %cst_31 = arith.constant dense<0.000000e+00> : vector<8x128xf32>
    %79 = tpu.matmul %77, %78, %cst_31 {dimension_numbers = #tpu.dot_dimension_numbers<[1], [1], [0], [0], [0, 0, 1, 0], [], []>} : vector<8x128xbf16>, vector<128x128xbf16>, vector<8x128xf32> -> vector<8x128xf32>
    %c16 = arith.constant 16 : index
    %c0_32 = arith.constant 0 : index
    %80 = vector.load %arg10[%c16, %c0_32] : memref<32x128xf32, #tpu.memory_space<vmem>>, vector<8x128xf32>
    tpu.vector_store %arg10[%c16, %c0_32], %79 {strides = array<i32>} : memref<32x128xf32, #tpu.memory_space<vmem>>, vector<8x128xf32>,
    %81 = vector.extract_strided_slice %12 {offsets = [24, 0], sizes = [8, 128], strides = [1, 1]} : vector<32x128xf32> to vector<8x128xf32>
    %82 = vector.extract_strided_slice %13 {offsets = [24, 0], sizes = [8, 128], strides = [1, 1]} : vector<32x128xf32> to vector<8x128xf32>
    %83 = vector.extract_strided_slice %14 {offsets = [24, 0], sizes = [8, 128], strides = [1, 1]} : vector<32x128xf32> to vector<8x128xf32>
    %cst_33 = arith.constant dense<0.000000e+00> : vector<128x128xf32>
    %84 = tpu.matmul %81, %82, %cst_33 {dimension_numbers = #tpu.dot_dimension_numbers<[0], [0], [1], [1], [0, 1, 1, 1], [], []>} : vector<8x128xf32>, vector<8x128xf32>, vector<128x128xf32> -> vector<128x128xf32>
    %c3 = arith.constant 3 : index
    %c0_34 = arith.constant 0 : index
    %c0_35 = arith.constant 0 : index
    %85 = vector.load %arg8[%c3, %c0_34, %c0_35] : memref<4x128x128xbf16, #tpu.memory_space<vmem>>, vector<1x128x128xbf16>
    %86 = vector.shape_cast %85 : vector<1x128x128xbf16> to vector<128x128xbf16>
    %87 = arith.extf %86 : vector<128x128xbf16> to vector<128x128xf32>
    %88 = arith.addf %84, %87 : vector<128x128xf32>
    %cst_36 = arith.constant dense<0xFF800000> : vector<128xf32>
    %89 = vector.multi_reduction <maximumf>, %88, %cst_36 [1] : vector<128x128xf32> to vector<128xf32>
    %90 = vector.shape_cast %89 : vector<128xf32> to vector<128x1xf32>
    %91 = vector.broadcast %90 : vector<128x1xf32> to vector<128x128xf32>
    %92 = arith.subf %88, %91 : vector<128x128xf32>
    %93 = math.exp %92 : vector<128x128xf32>
    %cst_37 = arith.constant dense<0.000000e+00> : vector<128xf32>
    %94 = vector.multi_reduction <add>, %93, %cst_37 [1] : vector<128x128xf32> to vector<128xf32>
    %95 = vector.shape_cast %94 : vector<128xf32> to vector<128x1xf32>
    %96 = tpu.reciprocal %95 {approx = true} : vector<128x1xf32> -> vector<128x1xf32>
    %97 = vector.broadcast %96 : vector<128x1xf32> to vector<128x128xf32>
    %98 = arith.mulf %93, %97 : vector<128x128xf32>
    %99 = arith.truncf %83 : vector<8x128xf32> to vector<8x128xbf16>
    %100 = arith.truncf %98 : vector<128x128xf32> to vector<128x128xbf16>
    %cst_38 = arith.constant dense<0.000000e+00> : vector<8x128xf32>
    %101 = tpu.matmul %99, %100, %cst_38 {dimension_numbers = #tpu.dot_dimension_numbers<[1], [1], [0], [0], [0, 0, 1, 0], [], []>} : vector<8x128xbf16>, vector<128x128xbf16>, vector<8x128xf32> -> vector<8x128xf32>
    %c24 = arith.constant 24 : index
    %c0_39 = arith.constant 0 : index
    %102 = vector.load %arg10[%c24, %c0_39] : memref<32x128xf32, #tpu.memory_space<vmem>>, vector<8x128xf32>
    tpu.vector_store %arg10[%c24, %c0_39], %101 {strides = array<i32>} : memref<32x128xf32, #tpu.memory_space<vmem>>, vector<8x128xf32>,
    %c0_40 = arith.constant 0 : index
    %c0_41 = arith.constant 0 : index
    %103 = vector.load %arg6[%c0_40, %c0_41] : memref<32x32xbf16, #tpu.memory_space<vmem>>, vector<32x32xbf16>
    %c0_42 = arith.constant 0 : index
    %c0_43 = arith.constant 0 : index
    %104 = vector.load %arg10[%c0_42, %c0_43] : memref<32x128xf32, #tpu.memory_space<vmem>>, vector<32x128xf32>
    %105 = arith.truncf %104 : vector<32x128xf32> to vector<32x128xbf16>
    %cst_44 = arith.constant dense<0.000000e+00> : vector<32x128xf32>
    %106 = tpu.matmul %103, %105, %cst_44 {dimension_numbers = #tpu.dot_dimension_numbers<[1], [0], [0], [1], [0, 0, 1, 1], [], []>} : vector<32x32xbf16>, vector<32x128xbf16>, vector<32x128xf32> -> vector<32x128xf32>
    %c0_45 = arith.constant 0 : index
    %c0_46 = arith.constant 0 : index
    %107 = vector.load %arg7[%c0_45, %c0_46] : memref<32x1xf32, #tpu.memory_space<vmem>>, vector<32x1xf32>
    %108 = vector.broadcast %107 : vector<32x1xf32> to vector<32x128xf32>
    %109 = arith.addf %106, %108 : vector<32x128xf32>
    %cst_47 = arith.constant 0.000000e+00 : f32
    %110 = vector.broadcast %cst_47 : f32 to vector<32x128xf32>
    %111 = arith.maximumf %109, %110 : vector<32x128xf32>
    %112 = vector.extract_strided_slice %111 {offsets = [0, 0], sizes = [32, 64], strides = [1, 1]} : vector<32x128xf32> to vector<32x64xf32>
    %c0_48 = arith.constant 0 : index
    %c0_49 = arith.constant 0 : index
    %c0_50 = arith.constant 0 : index
    %113 = vector.load %arg9[%c0_48, %c0_49, %c0_50] : memref<2x32x64xf32, #tpu.memory_space<vmem>>, vector<1x32x64xf32>
    %114 = vector.shape_cast %113 : vector<1x32x64xf32> to vector<32x64xf32>
    %115 = vector.shape_cast %112 : vector<32x64xf32> to vector<1x32x64xf32>
    tpu.vector_store %arg9[%c0_48, %c0_49, %c0_50], %115 {strides = array<i32>} : memref<2x32x64xf32, #tpu.memory_space<vmem>>, vector<1x32x64xf32>,
    %116 = vector.extract_strided_slice %111 {offsets = [0, 64], sizes = [32, 64], strides = [1, 1]} : vector<32x128xf32> to vector<32x64xf32>
    %c1_51 = arith.constant 1 : index
    %c0_52 = arith.constant 0 : index
    %c0_53 = arith.constant 0 : index
    %117 = vector.load %arg9[%c1_51, %c0_52, %c0_53] : memref<2x32x64xf32, #tpu.memory_space<vmem>>, vector<1x32x64xf32>
    %118 = vector.shape_cast %117 : vector<1x32x64xf32> to vector<32x64xf32>
    %119 = vector.shape_cast %116 : vector<32x64xf32> to vector<1x32x64xf32>
    tpu.vector_store %arg9[%c1_51, %c0_52, %c0_53], %119 {strides = array<i32>} : memref<2x32x64xf32, #tpu.memory_space<vmem>>, vector<1x32x64xf32>,
    return
  }
  func.func @transform_0(%arg0: i32) -> (i32, i32) {
    %c0_i32 = arith.constant 0 : i32
    %c0_i32_0 = arith.constant 0 : i32
    %c0_i32_1 = arith.constant 0 : i32
    return %c0_i32, %c0_i32_0 : i32, i32
  }
  func.func @transform_1(%arg0: i32) -> (i32, i32) {
    %c0_i32 = arith.constant 0 : i32
    %c0_i32_0 = arith.constant 0 : i32
    %c0_i32_1 = arith.constant 0 : i32
    return %c0_i32, %c0_i32_0 : i32, i32
  }
  func.func @transform_2(%arg0: i32) -> (i32, i32) {
    %c0_i32 = arith.constant 0 : i32
    %c0_i32_0 = arith.constant 0 : i32
    %c0_i32_1 = arith.constant 0 : i32
    return %c0_i32, %c0_i32_0 : i32, i32
  }
  func.func @transform_3(%arg0: i32) -> (i32, i32) {
    %c0_i32 = arith.constant 0 : i32
    %c0_i32_0 = arith.constant 0 : i32
    %c0_i32_1 = arith.constant 0 : i32
    return %c0_i32, %c0_i32_0 : i32, i32
  }
  func.func @transform_4(%arg0: i32) -> (i32, i32) {
    %c0_i32 = arith.constant 0 : i32
    %c0_i32_0 = arith.constant 0 : i32
    %c0_i32_1 = arith.constant 0 : i32
    return %c0_i32, %c0_i32_0 : i32, i32
  }
  func.func @transform_5(%arg0: i32) -> (i32, i32) {
    %c0_i32 = arith.constant 0 : i32
    %c0_i32_0 = arith.constant 0 : i32
    %c0_i32_1 = arith.constant 0 : i32
    return %c0_i32, %c0_i32_0 : i32, i32
  }
  func.func @transform_6(%arg0: i32) -> (i32, i32) {
    %c0_i32 = arith.constant 0 : i32
    %c0_i32_0 = arith.constant 0 : i32
    %c0_i32_1 = arith.constant 0 : i32
    return %c0_i32, %c0_i32_0 : i32, i32
  }
  func.func @transform_7(%arg0: i32) -> (i32, i32, i32) {
    %c0_i32 = arith.constant 0 : i32
    %c0_i32_0 = arith.constant 0 : i32
    %c0_i32_1 = arith.constant 0 : i32
    %c0_i32_2 = arith.constant 0 : i32
    return %c0_i32, %c0_i32_0, %c0_i32_1 : i32, i32, i32
  }
  func.func @transform_8(%arg0: i32) -> (i32, i32, i32) {
    %c0_i32 = arith.constant 0 : i32
    %c0_i32_0 = arith.constant 0 : i32
    %c0_i32_1 = arith.constant 0 : i32
    %c0_i32_2 = arith.constant 0 : i32
    return %c0_i32, %c0_i32_0, %c0_i32_1 : i32, i32, i32
  }
}

</mosaic_0001>

<bundles_post_ra>
// kernel: mixed_frequency_attention.1
= control target key start
LH: loop header
LB: loop body
LE: loop exit
PB: predicated region body
PF: predicated region fallthrough
CT: control target
= control target key end

     0   :  { %vm111_vm0 = vcmask 130048   ;;  %v3296_v2 = vmov 0   ;;  %vm241_vm1 = vcmask 261120   ;;  %vm457_vm2 = vcmask 64512   ;;  %s3299_s19 = smov 64   ;;  %s4313_s1 = inlined_call_operand.vmem [shape: f32[16,128], index: 1, kind: input, shape index: {}]   ;;  %s4314_s3 = inlined_call_operand.vmem [shape: bf16[96,16], index: 3, kind: input, shape index: {}]   ;;  %s4315_s0 = inlined_call_operand.vmem [shape: f32[128,32], index: 0, kind: input, shape index: {}]   ;;  %s4316_s2 = inlined_call_operand.vmem [shape: bf16[96,32], index: 2, kind: input, shape index: {}]   ;;  %s4317_s4 = inlined_call_operand.vmem [shape: f32[32,1], index: 4, kind: input, shape index: {}]   ;;  %s4318_s7 = inlined_call_operand.vmem [shape: bf16[4,128,128], index: 7, kind: input, shape index: {}]   ;;  %s4319_s6 = inlined_call_operand.vmem [shape: f32[32,1], index: 6, kind: input, shape index: {}]   ;;  %s4320_s5 = inlined_call_operand.vmem [shape: bf16[32,32], index: 5, kind: input, shape index: {}]   ;;  %s4321_s8 = inlined_call_operand.vmem [shape: f32[2,32,64], index: 8, kind: output, shape index: {}]  }
   0x1   :  { %v54_v0 = vld [vmem:[%s4313_s1] sm:$0xff]  ;;  %v55_v1 = vld [vmem:[%s4313_s1 + $0x8] sm:$0xff]  ;;  %3024 = vset.pattern.permute.xlu0 %v3296_v2  ;;  %3025 = vset.pattern.permute.xlu1 %v3296_v2  ;;  %v32_v9 = vld [vmem:[%s4315_s0 + $0x10] sm:$0xff]  ;;  %vm3298_vm3 = vmmov 0   ;;  %vm2304_vm4 = vcmask 523264  }
   0x2   :  { %v56_v3 = vpack.c.bf16 %v55_v1, %v54_v0  ;;  %v3026_v4 = vld [vmem:[%s4314_s3] sm:$0xff]   ;;  %v31_v6 = vld [vmem:[%s4315_s0 + $0x8] sm:$0xff]  ;;  %v33_v10 = vld [vmem:[%s4315_s0 + $0x18] sm:$0xff] }
   0x3   :  { %v30_v5 = vld [vmem:[%s4315_s0] sm:$0xff]  ;;  %2768 = vmatprep.mubr.msk.bf16.mxu0 %vm111_vm0, %v3026_v4  ;;  %v3027_v8 = vld [vmem:[%s4314_s3 + $0x8] sm:$0xff]   ;;  %v3028_v11 = vld [vmem:[%s4314_s3 + $0x10] sm:$0xff]   ;;  %v47_v13 = vpack.c.bf16 %v33_v10, %v32_v9 }
   0x4   :  { %2766 = vmatprep.subr.bf16.mxu0 %v56_v3  ;;  %v46_v7 = vpack.c.bf16 %v31_v6, %v30_v5  ;;  %v3029_v14 = vld [vmem:[%s4314_s3 + $0x18] sm:$0xff]   ;;  %v3030_v15 = vld [vmem:[%s4314_s3 + $0x20] sm:$0xff]   ;;  %v35_v17 = vld [vmem:[%s4315_s0 + $0x28] sm:$0xff] }
   0x5   :  { %2767 = vmatpush3.bf16.msra.mxu0 %v56_v3  ;;  %v34_v16 = vld [vmem:[%s4315_s0 + $0x20] sm:$0xff]  ;;  %v264_v18 = vsel %vm241_vm1, %v47_v13, 0  ;;  %v3031_v21 = vld [vmem:[%s4314_s3 + $0x28] sm:$0xff]   ;;  %v36_v23 = vld [vmem:[%s4315_s0 + $0x30] sm:$0xff] }
   0x6   :  { %3012 = vmatprep.subr.msk.bf16.mxu0 %vm241_vm1, %v46_v7  ;;  %v261_v12 = vsel %vm241_vm1, %v46_v7, 0  ;;  %v48_v19 = vpack.c.bf16 %v35_v17, %v34_v16  ;;  %v365_v20 = vld [vmem:[%s4317_s4] sm:$0xff]  ;;  %v37_v24 = vld [vmem:[%s4315_s0 + $0x38] sm:$0xff]  ;;  %v39_v28 = vld [vmem:[%s4315_s0 + $0x48] sm:$0xff] }
   0x7   :  { %371 = vperm.xlu0 %3024, %v365_v20   ;;  %v3032_v22 = vld [vmem:[%s4316_s2] sm:$0xff]   ;;  %v49_v26 = vpack.c.bf16 %v37_v24, %v36_v23  ;;  %v40_v31 = vld [vmem:[%s4315_s0 + $0x50] sm:$0xff]  ;;  %v41_v32 = vld [vmem:[%s4315_s0 + $0x58] sm:$0xff] }
   0x8   :  { %2769 = vmatmul.mubr.msk.bf16.vlgmr.msra.gmra.mrb[0].mxu0 %vm111_vm0, %v3027_v8  ;;  %v267_v25 = vsel %vm241_vm1, %v48_v19, 0  ;;  %v38_v27 = vld [vmem:[%s4315_s0 + $0x40] sm:$0xff]  ;;  %v51_v34 = vpack.c.bf16 %v41_v32, %v40_v31  ;;  %v43_v36 = vld [vmem:[%s4315_s0 + $0x68] sm:$0xff]  ;;  %v44_v39 = vld [vmem:[%s4315_s0 + $0x70] sm:$0xff] }
   0x9   :  { %2772 = vmatprep.mubr.msk.bf16.mxu0 %vm111_vm0, %v3028_v11  ;;  %v270_v29 = vsel %vm241_vm1, %v49_v26, 0  ;;  %v50_v30 = vpack.c.bf16 %v39_v28, %v38_v27  ;;  %v42_v35 = vld [vmem:[%s4315_s0 + $0x60] sm:$0xff]  ;;  %v45_v40 = vld [vmem:[%s4315_s0 + $0x78] sm:$0xff]  ;;  %v3033_v44 = vld [vmem:[%s4316_s2 + $0x8] sm:$0xff]  }
   0xa   :  { %v276_v37 = vsel %vm241_vm1, %v51_v34, 0  ;;  %v52_v38 = vpack.c.bf16 %v43_v36, %v42_v35  ;;  %v53_v42 = vpack.c.bf16 %v45_v40, %v44_v39  ;;  %v3034_v45 = vld [vmem:[%s4316_s2 + $0x10] sm:$0xff]   ;;  %v3035_v46 = vld [vmem:[%s4316_s2 + $0x18] sm:$0xff]   ;;  %v3036_v47 = vld [vmem:[%s4316_s2 + $0x20] sm:$0xff]  }
   0xb   :  { %v273_v33 = vsel %vm241_vm1, %v50_v30, 0  ;;  %v3037_v48 = vld [vmem:[%s4316_s2 + $0x28] sm:$0xff]   ;;  %v2607_v28 = vld [vmem:[%s4318_s7 + $0x10] sm:$0xff]   ;;  %v2608_v35 = vld [vmem:[%s4318_s7 + $0x18] sm:$0xff]  }
   0xc   :  { %v279_v41 = vsel %vm241_vm1, %v52_v38, 0  ;;  %v282_v43 = vsel %vm241_vm1, %v53_v42, 0  ;;  %v2492_v40 = vunpack.c.l.bf16 %v2608_v35 }
   0xe   :  { %2781 = vmatpush3.bf16.xpose.msra.mxu0 %v261_v12 }
   0xf   :  { %3013 = vmatprep.subr.msk.bf16.mxu0 %vm241_vm1, %v47_v13 }
  0x10   :  { %2773 = vmatmul.mubr.msk.bf16.gmra.mrb[4].mxu0 %vm111_vm0, %v3029_v14 }
  0x11   :  { %2776 = vmatprep.mubr.msk.bf16.mxu0 %vm111_vm0, %v3030_v15  ;;  %v2479_v15 = vld [vmem:[%s4318_s7] sm:$0xff]  }
  0x12   :  { %v2481_v16 = vunpack.c.h.bf16 %v2479_v15 }
  0x16   :  { %2783 = vmatpush3.bf16.xpose.msra.mxu0 %v264_v18 }
  0x17   :  { %3014 = vmatprep.subr.msk.bf16.mxu0 %vm241_vm1, %v48_v19  ;;  %v2480_v19 = vunpack.c.l.bf16 %v2479_v15 }
  0x18   :  { %2777 = vmatmul.mubr.msk.bf16.gmra.mrb[8].mxu0 %vm111_vm0, %v3031_v21  ;;  %v2606_v21 = vld [vmem:[%s4318_s7 + $0x8] sm:$0xff]  }
  0x19   :  { %2796 = vmatprep.mubr.msk.bf16.mxu0 %vm241_vm1, %v3032_v22  ;;  %v2485_v23 = vunpack.c.h.bf16 %v2606_v21 }
  0x1e   :  { %2785 = vmatpush3.bf16.xpose.msra.mxu0 %v267_v25 }
  0x1f   :  { %3015 = vmatprep.subr.msk.bf16.mxu0 %vm241_vm1, %v49_v26  ;;  %v2484_v26 = vunpack.c.l.bf16 %v2606_v21 }
  0x26   :  { %2787 = vmatpush3.bf16.xpose.msra.mxu0 %v270_v29 }
  0x27   :  { %3016 = vmatprep.subr.msk.bf16.mxu0 %vm241_vm1, %v50_v30  ;;  %v2489_v30 = vunpack.c.h.bf16 %v2607_v28 }
  0x2e   :  { %2789 = vmatpush3.bf16.xpose.msra.mxu0 %v273_v33  ;;  %v2488_v33 = vunpack.c.l.bf16 %v2607_v28 }
  0x2f   :  { %3017 = vmatprep.subr.msk.bf16.mxu0 %vm241_vm1, %v51_v34 }
  0x36   :  { %2791 = vmatpush3.bf16.xpose.msra.mxu0 %v276_v37  ;;  %v2493_v37 = vunpack.c.h.bf16 %v2608_v35 }
  0x37   :  { %3018 = vmatprep.subr.msk.bf16.mxu0 %vm241_vm1, %v52_v38 }
  0x3e   :  { %2793 = vmatpush3.bf16.xpose.msra.mxu0 %v279_v41 }
  0x3f   :  { %3019 = vmatprep.subr.msk.bf16.mxu0 %vm241_vm1, %v53_v42  ;;  %v2609_v42 = vld [vmem:[%s4318_s7 + $0x20] sm:$0xff]  }
  0x46   :  { %2795 = vmatpush3.bf16.xpose.msra.mxu0 %v282_v43 }
  0x4d   :  { %2797 = vmatmul.mubr.msk.bf16.vlgmr.msra.gmra.mrb[0].mxu0 %vm241_vm1, %v3033_v44  ;;  %v2497_v44 = vunpack.c.h.bf16 %v2609_v42 }
  0x4e   :  { %2800 = vmatprep.mubr.msk.bf16.mxu0 %vm241_vm1, %v3034_v45  ;;  %v2496_v45 = vunpack.c.l.bf16 %v2609_v42 }
  0x55   :  { %2801 = vmatmul.mubr.msk.bf16.gmra.mrb[4].mxu0 %vm241_vm1, %v3035_v46 }
  0x56   :  { %2804 = vmatprep.mubr.msk.bf16.mxu0 %vm241_vm1, %v3036_v47 }
  0x5d   :  { %2805 = vmatmul.mubr.msk.bf16.gmra.mrb[8].mxu0 %vm241_vm1, %v3037_v48 }
  0x86   :  { %v372_v49 = vpop.permute.xlu0 %371 }
 0x120   :  { %v3466_v50 = vpop.f32.mrb[0].mxu0 }
 0x121   :  { %v318_v51 = vpop.f32.mrb[1].mxu0 }
 0x122   :  { %v389_v52 = vadd.f32 %v372_v49, %v318_v51  ;;  %v3468_v53 = vpop.f32.mrb[2].mxu0  ;;  %v2610_v51 = vld [vmem:[%s4318_s7 + $0x28] sm:$0xff]  }
 0x123   :  { %v3470_v54 = vpop.f32.mrb[3].mxu0 }
 0x124   :  { %425 = vxpose.xlu0.b32.start.end [1/1] (short) %v389_v52, 128  ;;  %v2501_v52 = vunpack.c.h.bf16 %v2610_v51 }
 0x128   :  { %v3472_v55 = vpop.f32.mrb[4].mxu0 }
 0x129   :  { %v334_v56 = vpop.f32.mrb[5].mxu0 }
 0x12a   :  { %v3474_v57 = vpop.f32.mrb[6].mxu0  ;;  %2808 = vmatprep.subr.mxu1 %v334_v56 }
 0x12b   :  { %v3476_v58 = vpop.f32.mrb[7].mxu0  ;;  %2809 = vmatpush3.msra.mxu1 %v334_v56 }
 0x130   :  { %v3478_v59 = vpop.f32.mrb[8].mxu0 }
 0x131   :  { %v3480_v60 = vpop.f32.mrb[9].mxu0 }
 0x132   :  { %v3482_v61 = vpop.f32.mrb[10].mxu0 }
 0x133   :  { %v3484_v62 = vpop.f32.mrb[11].mxu0 }
 0x1a4   :  { %v441_v63 = vpop.trf.xlu0 }
 0x1a5   :  { %2810 = vmatprep.mubr.msk.f32.mxu1 %vm457_vm2, %v441_v63 }
 0x1a8   :  { %v442_v0 = vpop.trf.xlu0 }
 0x1a9   :  { %2811 = vmatmul.mubr.msk.f32.vlgmr.msra.gmra.mrb[0].mxu1 %vm457_vm2, %v442_v0  ;;  %v2500_v0 = vunpack.c.l.bf16 %v2610_v51 }
 0x1ac   :  { %v443_v1 = vpop.trf.xlu0 }
 0x1ad   :  { %2813 = vmatprep.mubr.msk.f32.mxu1 %vm457_vm2, %v443_v1 }
 0x1b0   :  { %v444_v2 = vpop.trf.xlu0 }
 0x1b1   :  { %2814 = vmatmul.mubr.msk.f32.gmra.mrb[2].mxu1 %vm457_vm2, %v444_v2  ;;  %v2611_v2 = vld [vmem:[%s4318_s7 + $0x30] sm:$0xff]  }
 0x1b4   :  { %v445_v3 = vpop.trf.xlu0 }
 0x1b5   :  { %2816 = vmatprep.mubr.msk.f32.mxu1 %vm457_vm2, %v445_v3 }
 0x1b8   :  { %v446_v4 = vpop.trf.xlu0 }
 0x1b9   :  { %2817 = vmatmul.mubr.msk.f32.gmra.mrb[4].mxu1 %vm457_vm2, %v446_v4  ;;  %v2505_v4 = vunpack.c.h.bf16 %v2611_v2 }
 0x1bc   :  { %v447_v5 = vpop.trf.xlu0 }
 0x1bd   :  { %2819 = vmatprep.mubr.msk.f32.mxu1 %vm457_vm2, %v447_v5 }
 0x1c0   :  { %v448_v6 = vpop.trf.xlu0 }
 0x1c1   :  { %2820 = vmatmul.mubr.msk.f32.gmra.mrb[6].mxu1 %vm457_vm2, %v448_v6 }
 0x1c4   :  { %v449_v7 = vpop.trf.xlu0 }
 0x1c5   :  { %2822 = vmatprep.mubr.msk.f32.mxu1 %vm457_vm2, %v449_v7  ;;  %v2504_v7 = vunpack.c.l.bf16 %v2611_v2 }
 0x1c8   :  { %v450_v8 = vpop.trf.xlu0 }
 0x1c9   :  { %2823 = vmatmul.mubr.msk.f32.gmra.mrb[8].mxu1 %vm457_vm2, %v450_v8 }
 0x1cc   :  { %v451_v9 = vpop.trf.xlu0 }
 0x1cd   :  { %2825 = vmatprep.mubr.msk.f32.mxu1 %vm457_vm2, %v451_v9  ;;  %v2612_v9 = vld [vmem:[%s4318_s7 + $0x38] sm:$0xff]  }
 0x1d0   :  { %v452_v10 = vpop.trf.xlu0 }
 0x1d1   :  { %2826 = vmatmul.mubr.msk.f32.gmra.mrb[10].mxu1 %vm457_vm2, %v452_v10 }
 0x1d4   :  { %v453_v11 = vpop.trf.xlu0 }
 0x1d5   :  { %2828 = vmatprep.mubr.msk.f32.mxu1 %vm457_vm2, %v453_v11  ;;  %v2509_v11 = vunpack.c.h.bf16 %v2612_v9 }
 0x1d8   :  { %v454_v12 = vpop.trf.xlu0 }
 0x1d9   :  { %2829 = vmatmul.mubr.msk.f32.gmra.mrb[12].mxu1 %vm457_vm2, %v454_v12  ;;  %v2508_v12 = vunpack.c.l.bf16 %v2612_v9 }
 0x1dc   :  { %v455_v13 = vpop.trf.xlu0 }
 0x1dd   :  { %2831 = vmatprep.mubr.msk.f32.mxu1 %vm457_vm2, %v455_v13 }
 0x1e0   :  { %v456_v14 = vpop.trf.xlu0 }
 0x1e1   :  { %2832 = vmatmul.mubr.msk.f32.gmra.mrb[14].mxu1 %vm457_vm2, %v456_v14 }
 0x27c   :  { %v2812_v17 = vpop.f32.mrb[0].mxu1 }
 0x27d   :  { %v3505_v18 = vadd.f32 %v2812_v17, %v2481_v16  ;;  %v572_v20 = vpop.f32.mrb[1].mxu1 }
 0x27e   :  { %v3511_v22 = vadd.f32 %v2480_v19, %v572_v20 }
 0x27f   :  { %653 = vmax.xlane.f32.xlu1 %v3505_v18 }
 0x283   :  { %651 = vmax.xlane.f32.xlu1 %v3511_v22 }
 0x284   :  { %v2815_v24 = vpop.f32.mrb[2].mxu1 }
 0x285   :  { %v3514_v25 = vadd.f32 %v2815_v24, %v2485_v23  ;;  %v582_v27 = vpop.f32.mrb[3].mxu1 }
 0x286   :  { %v3520_v29 = vadd.f32 %v2484_v26, %v582_v27 }
 0x287   :  { %657 = vmax.xlane.f32.xlu1 %v3514_v25 }
 0x28b   :  { %655 = vmax.xlane.f32.xlu1 %v3520_v29 }
 0x28c   :  { %v2818_v31 = vpop.f32.mrb[4].mxu1 }
 0x28d   :  { %v3523_v32 = vadd.f32 %v2818_v31, %v2489_v30  ;;  %v592_v34 = vpop.f32.mrb[5].mxu1 }
 0x28e   :  { %v3529_v36 = vadd.f32 %v2488_v33, %v592_v34 }
 0x28f   :  { %661 = vmax.xlane.f32.xlu1 %v3523_v32 }
 0x293   :  { %659 = vmax.xlane.f32.xlu1 %v3529_v36 }
 0x294   :  { %v2821_v38 = vpop.f32.mrb[6].mxu1 }
 0x295   :  { %v3532_v39 = vadd.f32 %v2821_v38, %v2493_v37  ;;  %v602_v41 = vpop.f32.mrb[7].mxu1 }
 0x296   :  { %v3538_v43 = vadd.f32 %v2492_v40, %v602_v41 }
 0x297   :  { %665 = vmax.xlane.f32.xlu1 %v3532_v39 }
 0x29b   :  { %663 = vmax.xlane.f32.xlu1 %v3538_v43 }
 0x29c   :  { %v2824_v46 = vpop.f32.mrb[8].mxu1 }
 0x29d   :  { %v3541_v47 = vadd.f32 %v2824_v46, %v2497_v44  ;;  %v612_v48 = vpop.f32.mrb[9].mxu1 }
 0x29e   :  { %v3543_v49 = vadd.f32 %v2496_v45, %v612_v48 }
 0x29f   :  { %669 = vmax.xlane.f32.xlu0 %v3541_v47 }
 0x2a0   :  { %667 = vmax.xlane.f32.xlu1 %v3543_v49 }
 0x2a4   :  { %v2827_v56 = vpop.f32.mrb[10].mxu1 }
 0x2a5   :  { %v3550_v63 = vadd.f32 %v2827_v56, %v2501_v52  ;;  %v622_v1 = vpop.f32.mrb[11].mxu1 }
 0x2a6   :  { %v3556_v3 = vadd.f32 %v2500_v0, %v622_v1 }
 0x2a7   :  { %673 = vmax.xlane.f32.xlu1 %v3550_v63 }
 0x2ab   :  { %671 = vmax.xlane.f32.xlu1 %v3556_v3 }
 0x2ac   :  { %v2830_v5 = vpop.f32.mrb[12].mxu1 }
 0x2ad   :  { %v3559_v6 = vadd.f32 %v2830_v5, %v2505_v4  ;;  %v632_v8 = vpop.f32.mrb[13].mxu1 }
 0x2ae   :  { %v3565_v10 = vadd.f32 %v2504_v7, %v632_v8 }
 0x2af   :  { %677 = vmax.xlane.f32.xlu1 %v3559_v6 }
 0x2b3   :  { %675 = vmax.xlane.f32.xlu1 %v3565_v10 }
 0x2b4   :  { %v2833_v13 = vpop.f32.mrb[14].mxu1 }
 0x2b5   :  { %v3568_v14 = vadd.f32 %v2833_v13, %v2509_v11  ;;  %v642_v15 = vpop.f32.mrb[15].mxu1 }
 0x2b6   :  { %v3571_v16 = vadd.f32 %v2508_v12, %v642_v15  ;;  %v3297_v12 = vmov 0.0  }
 0x2b7   :  { %681 = vmax.xlane.f32.xlu1 %v3568_v14  ;;  %2834 = vmatprep.subr.bf16.mxu1 %v3297_v12 }
 0x2b8   :  { %2880 = vmatprep.subr.bf16.mxu0 %v3297_v12  ;;  %2850 = vmatprep.mubr.msk.bf16.mxu1 %vm3298_vm3, %v3297_v12 }
 0x2b9   :  { %2896 = vmatprep.mubr.msk.bf16.mxu0 %vm3298_vm3, %v3297_v12 }
 0x2bb   :  { %679 = vmax.xlane.f32.xlu1 %v3571_v16 }
 0x30c   :  { %v654_v17 = vpop.xlane.xlu1 %653 }
 0x30d   :  { %v684_v19 = vsub.f32 %v3505_v18, %v654_v17 }
 0x30f   :  { %v701_v20 = vmul.f32 1.442695, %v684_v19 }
 0x310   :  { %v652_v21 = vpop.xlane.xlu1 %651 }
 0x311   :  { %3040 = vpow2.f32 %v701_v20  ;;  %v683_v23 = vsub.f32 %v3511_v22, %v652_v21 }
 0x313   :  { %v699_v24 = vmul.f32 1.442695, %v683_v23 }
 0x314   :  { %v658_v26 = vpop.xlane.xlu1 %657 }
 0x315   :  { %3042 = vpow2.f32 %v699_v24  ;;  %v686_v27 = vsub.f32 %v3514_v25, %v658_v26 }
 0x317   :  { %v705_v28 = vmul.f32 1.442695, %v686_v27 }
 0x318   :  { %v656_v30 = vpop.xlane.xlu1 %655 }
 0x319   :  { %3044 = vpow2.f32 %v705_v28  ;;  %v685_v31 = vsub.f32 %v3520_v29, %v656_v30 }
 0x31b   :  { %v3578_v33 = vpop.eup %3040  ;;  %v703_v34 = vmul.f32 1.442695, %v685_v31 }
 0x31c   :  { %733 = vadd.xlane.f32.xlu1 %v3578_v33  ;;  %v662_v18 = vpop.xlane.xlu1 %661 }
 0x31d   :  { %3046 = vpow2.f32 %v703_v34  ;;  %v688_v35 = vsub.f32 %v3523_v32, %v662_v18 }
 0x31f   :  { %v3582_v22 = vpop.eup %3042  ;;  %v709_v37 = vmul.f32 1.442695, %v688_v35 }
 0x320   :  { %731 = vadd.xlane.f32.xlu1 %v3582_v22  ;;  %v660_v25 = vpop.xlane.xlu1 %659 }
 0x321   :  { %3048 = vpow2.f32 %v709_v37  ;;  %v687_v38 = vsub.f32 %v3529_v36, %v660_v25 }
 0x323   :  { %v3586_v40 = vpop.eup %3044  ;;  %v707_v29 = vmul.f32 1.442695, %v687_v38 }
 0x324   :  { %737 = vadd.xlane.f32.xlu1 %v3586_v40  ;;  %v666_v41 = vpop.xlane.xlu1 %665 }
 0x325   :  { %3050 = vpow2.f32 %v707_v29  ;;  %v690_v42 = vsub.f32 %v3532_v39, %v666_v41 }
 0x327   :  { %v3590_v44 = vpop.eup %3046  ;;  %v713_v32 = vmul.f32 1.442695, %v690_v42 }
 0x328   :  { %735 = vadd.xlane.f32.xlu1 %v3590_v44  ;;  %v664_v45 = vpop.xlane.xlu1 %663 }
 0x329   :  { %3052 = vpow2.f32 %v713_v32  ;;  %v689_v46 = vsub.f32 %v3538_v43, %v664_v45 }
 0x32b   :  { %v3594_v48 = vpop.eup %3048  ;;  %v711_v36 = vmul.f32 1.442695, %v689_v46 }
 0x32c   :  { %v670_v51 = vpop.xlane.xlu0 %669  ;;  %741 = vadd.xlane.f32.xlu1 %v3594_v48 }
 0x32d   :  { %3054 = vpow2.f32 %v711_v36  ;;  %v692_v52 = vsub.f32 %v3541_v47, %v670_v51  ;;  %v668_v56 = vpop.xlane.xlu1 %667 }
 0x32e   :  { %v691_v39 = vsub.f32 %v3543_v49, %v668_v56 }
 0x32f   :  { %v3599_v0 = vpop.eup %3050  ;;  %v717_v1 = vmul.f32 1.442695, %v692_v52 }
 0x330   :  { %739 = vadd.xlane.f32.xlu1 %v3599_v0  ;;  %v715_v2 = vmul.f32 1.442695, %v691_v39 }
 0x331   :  { %3056 = vpow2.f32 %v717_v1 }
 0x332   :  { %3058 = vpow2.f32 %v715_v2 }
 0x333   :  { %v3602_v43 = vpop.eup %3052 }
 0x334   :  { %745 = vadd.xlane.f32.xlu1 %v3602_v43  ;;  %v674_v4 = vpop.xlane.xlu1 %673 }
 0x335   :  { %v694_v5 = vsub.f32 %v3550_v63, %v674_v4 }
 0x337   :  { %v3606_v7 = vpop.eup %3054  ;;  %v721_v47 = vmul.f32 1.442695, %v694_v5 }
 0x338   :  { %743 = vadd.xlane.f32.xlu1 %v3606_v7  ;;  %v672_v49 = vpop.xlane.xlu1 %671 }
 0x339   :  { %3060 = vpow2.f32 %v721_v47  ;;  %v693_v8 = vsub.f32 %v3556_v3, %v672_v49 }
 0x33b   :  { %v3610_v9 = vpop.eup %3056  ;;  %v719_v11 = vmul.f32 1.442695, %v693_v8 }
 0x33c   :  { %749 = vadd.xlane.f32.xlu1 %v3610_v9  ;;  %v678_v63 = vpop.xlane.xlu1 %677  ;;  %v3616_v15 = vpop.eup %3058 }
 0x33d   :  { %3062 = vpow2.f32 %v719_v11  ;;  %v696_v13 = vsub.f32 %v3559_v6, %v678_v63 }
 0x33f   :  { %v725_v17 = vmul.f32 1.442695, %v696_v13 }
 0x340   :  { %747 = vadd.xlane.f32.xlu1 %v3616_v15  ;;  %v676_v3 = vpop.xlane.xlu1 %675 }
 0x341   :  { %3064 = vpow2.f32 %v725_v17  ;;  %v695_v19 = vsub.f32 %v3565_v10, %v676_v3 }
 0x343   :  { %v3620_v20 = vpop.eup %3060  ;;  %v723_v21 = vmul.f32 1.442695, %v695_v19 }
 0x344   :  { %753 = vadd.xlane.f32.xlu1 %v3620_v20  ;;  %v682_v23 = vpop.xlane.xlu1 %681 }
 0x345   :  { %3066 = vpow2.f32 %v723_v21  ;;  %v698_v24 = vsub.f32 %v3568_v14, %v682_v23  ;;  %v366_v14 = vld [vmem:[%s4317_s4 + $0x8] sm:$0xff] }
 0x347   :  { %v3624_v26 = vpop.eup %3062  ;;  %v729_v6 = vmul.f32 1.442695, %v698_v24 }
 0x348   :  { %751 = vadd.xlane.f32.xlu1 %v3624_v26  ;;  %v680_v30 = vpop.xlane.xlu1 %679 }
 0x349   :  { %3068 = vpow2.f32 %v729_v6  ;;  %v697_v31 = vsub.f32 %v3571_v16, %v680_v30 }
 0x34b   :  { %v3627_v27 = vpop.eup %3064  ;;  %v727_v34 = vmul.f32 1.442695, %v697_v31 }
 0x34c   :  { %757 = vadd.xlane.f32.xlu1 %v3627_v27 }
 0x34d   :  { %3070 = vpow2.f32 %v727_v34 }
 0x34f   :  { %v3630_v10 = vpop.eup %3066 }
 0x350   :  { %755 = vadd.xlane.f32.xlu1 %v3630_v10 }
 0x353   :  { %v3633_v28 = vpop.eup %3068 }
 0x354   :  { %761 = vadd.xlane.f32.xlu0 %v3633_v28 }
 0x357   :  { %v3640_v18 = vpop.eup %3070 }
 0x361   :  { %376 = vperm.xlu1 %3025, %v366_v14  }
 0x385   :  { %759 = vadd.xlane.f32.xlu1 %v3640_v18 }
 0x3a9   :  { %v734_v35 = vpop.xlane.xlu1 %733 }
 0x3aa   :  { %3072 = vrcp.f32 %v734_v35 }
 0x3ad   :  { %v732_v37 = vpop.xlane.xlu1 %731 }
 0x3ae   :  { %3074 = vrcp.f32 %v732_v37 }
 0x3b1   :  { %v738_v25 = vpop.xlane.xlu1 %737 }
 0x3b2   :  { %3076 = vrcp.f32 %v738_v25 }
 0x3b4   :  { %v3073_v38 = vpop.eup %3072 }
 0x3b5   :  { %v736_v16 = vpop.xlane.xlu1 %735  ;;  %v780_v32 = vmul.f32 %v3073_v38, %v3578_v33 }
 0x3b6   :  { %3078 = vrcp.f32 %v736_v16 }
 0x3b8   :  { %v3075_v29 = vpop.eup %3074 }
 0x3b9   :  { %v742_v41 = vpop.xlane.xlu1 %741  ;;  %v779_v42 = vmul.f32 %v3075_v29, %v3582_v22 }
 0x3ba   :  { %3080 = vrcp.f32 %v742_v41 }
 0x3bb   :  { %v796_v45 = vpack.c.bf16 %v780_v32, %v779_v42 }
 0x3bc   :  { %v3077_v36 = vpop.eup %3076 }
 0x3bd   :  { %2835 = vmatpush3.bf16.xpose.msra.mxu1 %v796_v45  ;;  %v740_v46 = vpop.xlane.xlu1 %739  ;;  %v782_v39 = vmul.f32 %v3077_v36, %v3586_v40 }
 0x3be   :  { %3082 = vrcp.f32 %v740_v46  ;;  %2836 = vmatprep.subr.bf16.mxu1 %v3297_v12 }
 0x3c0   :  { %v3079_v51 = vpop.eup %3078 }
 0x3c1   :  { %v746_v52 = vpop.xlane.xlu1 %745  ;;  %v781_v56 = vmul.f32 %v3079_v51, %v3590_v44 }
 0x3c2   :  { %3084 = vrcp.f32 %v746_v52 }
 0x3c3   :  { %v797_v1 = vpack.c.bf16 %v782_v39, %v781_v56 }
 0x3c4   :  { %v3081_v2 = vpop.eup %3080 }
 0x3c5   :  { %2837 = vmatpush3.bf16.xpose.msra.mxu1 %v797_v1  ;;  %v744_v22 = vpop.xlane.xlu1 %743  ;;  %v784_v47 = vmul.f32 %v3081_v2, %v3594_v48 }
 0x3c6   :  { %3086 = vrcp.f32 %v744_v22  ;;  %2838 = vmatprep.subr.bf16.mxu1 %v3297_v12 }
 0x3c8   :  { %v3083_v33 = vpop.eup %3082 }
 0x3c9   :  { %v750_v4 = vpop.xlane.xlu1 %749  ;;  %v783_v5 = vmul.f32 %v3083_v33, %v3599_v0 }
 0x3ca   :  { %3088 = vrcp.f32 %v750_v4 }
 0x3cb   :  { %v798_v49 = vpack.c.bf16 %v784_v47, %v783_v5  ;;  %v2613_v47 = vld [vmem:[%s4318_s7 + $0x40] sm:$0xff]  }
 0x3cc   :  { %v3085_v8 = vpop.eup %3084 }
 0x3cd   :  { %2839 = vmatpush3.bf16.xpose.msra.mxu1 %v798_v49  ;;  %v748_v44 = vpop.xlane.xlu1 %747  ;;  %v786_v13 = vmul.f32 %v3085_v8, %v3602_v43  ;;  %v2513_v49 = vunpack.c.h.bf16 %v2613_v47 }
 0x3ce   :  { %3090 = vrcp.f32 %v748_v44  ;;  %2840 = vmatprep.subr.bf16.mxu1 %v3297_v12 }
 0x3d0   :  { %v3087_v40 = vpop.eup %3086 }
 0x3d1   :  { %v754_v11 = vpop.xlane.xlu1 %753  ;;  %v785_v63 = vmul.f32 %v3087_v40, %v3606_v7  ;;  %v2512_v40 = vunpack.c.l.bf16 %v2613_v47 }
 0x3d2   :  { %3092 = vrcp.f32 %v754_v11 }
 0x3d3   :  { %v799_v17 = vpack.c.bf16 %v786_v13, %v785_v63  ;;  %v2614_v63 = vld [vmem:[%s4318_s7 + $0x48] sm:$0xff]  }
 0x3d4   :  { %v3089_v3 = vpop.eup %3088 }
 0x3d5   :  { %2841 = vmatpush3.bf16.xpose.msra.mxu1 %v799_v17  ;;  %v752_v0 = vpop.xlane.xlu1 %751  ;;  %v788_v23 = vmul.f32 %v3089_v3, %v3610_v9  ;;  %v2517_v17 = vunpack.c.h.bf16 %v2614_v63 }
 0x3d6   :  { %3094 = vrcp.f32 %v752_v0  ;;  %2842 = vmatprep.subr.bf16.mxu1 %v3297_v12 }
 0x3d8   :  { %v3091_v48 = vpop.eup %3090 }
 0x3d9   :  { %v758_v19 = vpop.xlane.xlu1 %757  ;;  %v787_v21 = vmul.f32 %v3091_v48, %v3616_v15  ;;  %v2516_v48 = vunpack.c.l.bf16 %v2614_v63 }
 0x3da   :  { %3096 = vrcp.f32 %v758_v19 }
 0x3db   :  { %v800_v24 = vpack.c.bf16 %v788_v23, %v787_v21  ;;  %v2615_v21 = vld [vmem:[%s4318_s7 + $0x50] sm:$0xff]  }
 0x3dc   :  { %v3093_v6 = vpop.eup %3092 }
 0x3dd   :  { %2843 = vmatpush3.bf16.xpose.msra.mxu1 %v800_v24  ;;  %v756_v7 = vpop.xlane.xlu1 %755  ;;  %v790_v31 = vmul.f32 %v3093_v6, %v3620_v20  ;;  %v2521_v24 = vunpack.c.h.bf16 %v2615_v21 }
 0x3de   :  { %3098 = vrcp.f32 %v756_v7  ;;  %2844 = vmatprep.subr.bf16.mxu1 %v3297_v12  ;;  %v2520_v7 = vunpack.c.l.bf16 %v2615_v21 }
 0x3e0   :  { %v3095_v43 = vpop.eup %3094 }
 0x3e1   :  { %v377_v14 = vpop.permute.xlu1 %376  ;;  %v789_v30 = vmul.f32 %v3095_v43, %v3624_v26  ;;  %v762_v26 = vpop.xlane.xlu0 %761 }
 0x3e2   :  { %v390_v34 = vadd.f32 %v377_v14, %v3470_v54  ;;  %3100 = vrcp.f32 %v762_v26 }
 0x3e3   :  { %v801_v35 = vpack.c.bf16 %v790_v31, %v789_v30  ;;  %v2616_v31 = vld [vmem:[%s4318_s7 + $0x58] sm:$0xff]  }
 0x3e4   :  { %878 = vxpose.xlu0.b32.start.end [1/1] (short) %v390_v34, 128  ;;  %v3097_v9 = vpop.eup %3096  ;;  %v2525_v34 = vunpack.c.h.bf16 %v2616_v31 }
 0x3e5   :  { %2845 = vmatpush3.bf16.xpose.msra.mxu1 %v801_v35  ;;  %v792_v25 = vmul.f32 %v3097_v9, %v3627_v27  ;;  %v795_v27 = vpack.c.bf16 %v3480_v60, %v3480_v60 }
 0x3e6   :  { %2846 = vmatprep.subr.bf16.mxu1 %v3297_v12 }
 0x3e8   :  { %v3099_v15 = vpop.eup %3098 }
 0x3e9   :  { %v791_v37 = vmul.f32 %v3099_v15, %v3630_v10  ;;  %v2524_v15 = vunpack.c.l.bf16 %v2616_v31 }
 0x3eb   :  { %v802_v16 = vpack.c.bf16 %v792_v25, %v791_v37  ;;  %v2617_v25 = vld [vmem:[%s4318_s7 + $0x60] sm:$0xff]  }
 0x3ec   :  { %v3101_v54 = vpop.eup %3100  ;;  %v2529_v26 = vunpack.c.h.bf16 %v2617_v25 }
 0x3ed   :  { %2847 = vmatpush3.bf16.xpose.msra.mxu1 %v802_v16  ;;  %v794_v41 = vmul.f32 %v3101_v54, %v3633_v28 }
 0x3ee   :  { %2848 = vmatprep.subr.bf16.mxu1 %v3297_v12 }
 0x412   :  { %v760_v20 = vpop.xlane.xlu1 %759 }
 0x413   :  { %3102 = vrcp.f32 %v760_v20 }
 0x41d   :  { %v3103_v38 = vpop.eup %3102 }
 0x41e   :  { %v793_v29 = vmul.f32 %v3103_v38, %v3640_v18  ;;  %v2528_v38 = vunpack.c.l.bf16 %v2617_v25 }
 0x420   :  { %v803_v42 = vpack.c.bf16 %v794_v41, %v793_v29  ;;  %v2618_v41 = vld [vmem:[%s4318_s7 + $0x68] sm:$0xff]  }
 0x422   :  { %2849 = vmatpush3.bf16.xpose.msra.mxu1 %v803_v42 }
 0x423   :  { %2854 = vmatprep.subr.mxu1 %v3476_v58 }
 0x429   :  { %2851 = vmatmul.mubr.bf16.vlgmr.msra.gmra.mrb[16].mxu1 %v795_v27  ;;  %v2533_v27 = vunpack.c.h.bf16 %v2618_v41 }
 0x42a   :  { %2855 = vmatpush3.msra.mxu1 %v3476_v58 }
 0x42b   :  { %2900 = vmatprep.subr.mxu1 %v3472_v55 }
 0x464   :  { %v894_v10 = vpop.trf.xlu0 }
 0x465   :  { %2856 = vmatprep.mubr.msk.f32.mxu1 %vm457_vm2, %v894_v10  ;;  %v368_v10 = vld [vmem:[%s4317_s4 + $0x18] sm:$0xff] }
 0x468   :  { %v895_v32 = vpop.trf.xlu0 }
 0x469   :  { %2857 = vmatmul.mubr.msk.f32.vlgmr.msra.gmra.mrb[20].mxu1 %vm457_vm2, %v895_v32 }
 0x46a   :  { %2901 = vmatpush3.msra.mxu1 %v3472_v55 }
 0x46b   :  { %2926 = vmatprep.subr.bf16.mxu1 %v3297_v12 }
 0x46c   :  { %v896_v28 = vpop.trf.xlu0 }
 0x46d   :  { %2859 = vmatprep.mubr.msk.f32.mxu1 %vm457_vm2, %v896_v28 }
 0x470   :  { %v897_v18 = vpop.trf.xlu0 }
 0x471   :  { %2860 = vmatmul.mubr.msk.f32.gmra.mrb[22].mxu1 %vm457_vm2, %v897_v18  ;;  %v2532_v18 = vunpack.c.l.bf16 %v2618_v41 }
 0x474   :  { %v898_v60 = vpop.trf.xlu0 }
 0x475   :  { %2862 = vmatprep.mubr.msk.f32.mxu1 %vm457_vm2, %v898_v60 }
 0x478   :  { %v899_v58 = vpop.trf.xlu0 }
 0x479   :  { %2863 = vmatmul.mubr.msk.f32.gmra.mrb[24].mxu1 %vm457_vm2, %v899_v58  ;;  %v2619_v58 = vld [vmem:[%s4318_s7 + $0x70] sm:$0xff]  }
 0x47c   :  { %v900_v45 = vpop.trf.xlu0 }
 0x47d   :  { %2865 = vmatprep.mubr.msk.f32.mxu1 %vm457_vm2, %v900_v45 }
 0x480   :  { %v901_v46 = vpop.trf.xlu0 }
 0x481   :  { %2866 = vmatmul.mubr.msk.f32.gmra.mrb[26].mxu1 %vm457_vm2, %v901_v46  ;;  %v2537_v46 = vunpack.c.h.bf16 %v2619_v58 }
 0x484   :  { %v902_v55 = vpop.trf.xlu0 }
 0x485   :  { %2868 = vmatprep.mubr.msk.f32.mxu1 %vm457_vm2, %v902_v55 }
 0x488   :  { %v903_v36 = vpop.trf.xlu0 }
 0x489   :  { %2869 = vmatmul.mubr.msk.f32.gmra.mrb[28].mxu1 %vm457_vm2, %v903_v36 }
 0x48c   :  { %v904_v51 = vpop.trf.xlu0 }
 0x48d   :  { %2871 = vmatprep.mubr.msk.f32.mxu1 %vm457_vm2, %v904_v51  ;;  %v2536_v51 = vunpack.c.l.bf16 %v2619_v58 }
 0x490   :  { %v905_v52 = vpop.trf.xlu0 }
 0x491   :  { %2872 = vmatmul.mubr.msk.f32.gmra.mrb[30].mxu1 %vm457_vm2, %v905_v52 }
 0x494   :  { %v906_v56 = vpop.trf.xlu0 }
 0x495   :  { %2874 = vmatprep.mubr.msk.f32.mxu1 %vm457_vm2, %v906_v56  ;;  %v2620_v56 = vld [vmem:[%s4318_s7 + $0x78] sm:$0xff]  }
 0x498   :  { %v907_v39 = vpop.trf.xlu0 }
 0x499   :  { %2875 = vmatmul.mubr.msk.f32.gmra.mrb[32].mxu1 %vm457_vm2, %v907_v39 }
 0x49c   :  { %v908_v1 = vpop.trf.xlu0 }
 0x49d   :  { %2877 = vmatprep.mubr.msk.f32.mxu1 %vm457_vm2, %v908_v1  ;;  %v2541_v1 = vunpack.c.h.bf16 %v2620_v56 }
 0x4a0   :  { %v909_v22 = vpop.trf.xlu0 }
 0x4a1   :  { %2878 = vmatmul.mubr.msk.f32.gmra.mrb[34].mxu1 %vm457_vm2, %v909_v22  ;;  %v2540_v22 = vunpack.c.l.bf16 %v2620_v56 }
 0x4fc   :  { %v3694_v2 = vpop.f32.mrb[16].mxu1 }
 0x4fd   :  { %v2852_v33 = vpop.f32.mrb[17].mxu1 }
 0x4fe   :  { %v841_v4 = vpop.f32.mrb[18].mxu1 }
 0x4ff   :  { %v2853_v5 = vpop.f32.mrb[19].mxu1 }
 0x53c   :  { %v2858_v44 = vpop.f32.mrb[20].mxu1 }
 0x53d   :  { %v3699_v8 = vadd.f32 %v2858_v44, %v2513_v49  ;;  %v1024_v11 = vpop.f32.mrb[21].mxu1 }
 0x53e   :  { %v3705_v13 = vadd.f32 %v2512_v40, %v1024_v11 }
 0x53f   :  { %1105 = vmax.xlane.f32.xlu1 %v3699_v8 }
 0x543   :  { %1103 = vmax.xlane.f32.xlu1 %v3705_v13 }
 0x544   :  { %v2861_v0 = vpop.f32.mrb[22].mxu1 }
 0x545   :  { %v3708_v3 = vadd.f32 %v2861_v0, %v2517_v17  ;;  %v1034_v19 = vpop.f32.mrb[23].mxu1 }
 0x546   :  { %v3714_v23 = vadd.f32 %v2516_v48, %v1034_v19 }
 0x547   :  { %1109 = vmax.xlane.f32.xlu1 %v3708_v3 }
 0x54b   :  { %1107 = vmax.xlane.f32.xlu1 %v3714_v23 }
 0x54c   :  { %v2864_v6 = vpop.f32.mrb[24].mxu1 }
 0x54d   :  { %v3717_v43 = vadd.f32 %v2864_v6, %v2521_v24  ;;  %v1044_v14 = vpop.f32.mrb[25].mxu1 }
 0x54e   :  { %v3719_v30 = vadd.f32 %v2520_v7, %v1044_v14 }
 0x54f   :  { %1113 = vmax.xlane.f32.xlu0 %v3717_v43 }
 0x550   :  { %1111 = vmax.xlane.f32.xlu1 %v3719_v30 }
 0x554   :  { %v2867_v35 = vpop.f32.mrb[26].mxu1 }
 0x555   :  { %v3726_v9 = vadd.f32 %v2867_v35, %v2525_v34  ;;  %v1054_v37 = vpop.f32.mrb[27].mxu1 }
 0x556   :  { %v3732_v16 = vadd.f32 %v2524_v15, %v1054_v37 }
 0x557   :  { %1117 = vmax.xlane.f32.xlu1 %v3726_v9 }
 0x55b   :  { %1115 = vmax.xlane.f32.xlu1 %v3732_v16 }
 0x55c   :  { %v2870_v20 = vpop.f32.mrb[28].mxu1 }
 0x55d   :  { %v3735_v54 = vadd.f32 %v2870_v20, %v2529_v26  ;;  %v1064_v29 = vpop.f32.mrb[29].mxu1 }
 0x55e   :  { %v3741_v42 = vadd.f32 %v2528_v38, %v1064_v29 }
 0x55f   :  { %1121 = vmax.xlane.f32.xlu1 %v3735_v54 }
 0x563   :  { %1119 = vmax.xlane.f32.xlu1 %v3741_v42 }
 0x564   :  { %v2873_v32 = vpop.f32.mrb[30].mxu1 }
 0x565   :  { %v3747_v28 = vadd.f32 %v2873_v32, %v2533_v27  ;;  %386 = vperm.xlu0 %3024, %v368_v10   ;;  %v1074_v60 = vpop.f32.mrb[31].mxu1 }
 0x566   :  { %v3753_v45 = vadd.f32 %v2532_v18, %v1074_v60 }
 0x567   :  { %1125 = vmax.xlane.f32.xlu1 %v3747_v28 }
 0x56b   :  { %1123 = vmax.xlane.f32.xlu1 %v3753_v45 }
 0x56c   :  { %v2876_v55 = vpop.f32.mrb[32].mxu1 }
 0x56d   :  { %v3756_v36 = vadd.f32 %v2876_v55, %v2537_v46  ;;  %v1084_v52 = vpop.f32.mrb[33].mxu1 }
 0x56e   :  { %v3762_v39 = vadd.f32 %v2536_v51, %v1084_v52 }
 0x56f   :  { %1129 = vmax.xlane.f32.xlu1 %v3756_v36 }
 0x573   :  { %1127 = vmax.xlane.f32.xlu1 %v3762_v39 }
 0x574   :  { %v2879_v33 = vpop.f32.mrb[34].mxu1 }
 0x575   :  { %v3765_v4 = vadd.f32 %v2879_v33, %v2541_v1  ;;  %v1094_v5 = vpop.f32.mrb[35].mxu1 }
 0x576   :  { %v3768_v47 = vadd.f32 %v2540_v22, %v1094_v5 }
 0x577   :  { %1133 = vmax.xlane.f32.xlu1 %v3765_v4 }
 0x57b   :  { %1131 = vmax.xlane.f32.xlu1 %v3768_v47 }
 0x5cc   :  { %v1106_v49 = vpop.xlane.xlu1 %1105 }
 0x5cd   :  { %v1136_v44 = vsub.f32 %v3699_v8, %v1106_v49 }
 0x5cf   :  { %v1153_v40 = vmul.f32 1.442695, %v1136_v44 }
 0x5d0   :  { %v1104_v11 = vpop.xlane.xlu1 %1103 }
 0x5d1   :  { %3104 = vpow2.f32 %v1153_v40  ;;  %v1135_v63 = vsub.f32 %v3705_v13, %v1104_v11 }
 0x5d3   :  { %v1151_v17 = vmul.f32 1.442695, %v1135_v63 }
 0x5d4   :  { %v1110_v0 = vpop.xlane.xlu1 %1109 }
 0x5d5   :  { %3106 = vpow2.f32 %v1151_v17  ;;  %v1138_v48 = vsub.f32 %v3708_v3, %v1110_v0 }
 0x5d7   :  { %v1157_v19 = vmul.f32 1.442695, %v1138_v48 }
 0x5d8   :  { %v1108_v21 = vpop.xlane.xlu1 %1107 }
 0x5d9   :  { %3108 = vpow2.f32 %v1157_v19  ;;  %v1137_v24 = vsub.f32 %v3714_v23, %v1108_v21 }
 0x5db   :  { %v3775_v7 = vpop.eup %3104  ;;  %v1155_v6 = vmul.f32 1.442695, %v1137_v24 }
 0x5dc   :  { %v1114_v14 = vpop.xlane.xlu0 %1113  ;;  %1185 = vadd.xlane.f32.xlu1 %v3775_v7 }
 0x5dd   :  { %3110 = vpow2.f32 %v1155_v6  ;;  %v1140_v8 = vsub.f32 %v3717_v43, %v1114_v14  ;;  %v1112_v13 = vpop.xlane.xlu1 %1111 }
 0x5de   :  { %v1139_v31 = vsub.f32 %v3719_v30, %v1112_v13 }
 0x5df   :  { %v3780_v34 = vpop.eup %3106  ;;  %v1161_v3 = vmul.f32 1.442695, %v1140_v8 }
 0x5e0   :  { %1183 = vadd.xlane.f32.xlu1 %v3780_v34  ;;  %v1159_v35 = vmul.f32 1.442695, %v1139_v31 }
 0x5e1   :  { %3112 = vpow2.f32 %v1161_v3 }
 0x5e2   :  { %3114 = vpow2.f32 %v1159_v35 }
 0x5e3   :  { %v3783_v23 = vpop.eup %3108 }
 0x5e4   :  { %1189 = vadd.xlane.f32.xlu1 %v3783_v23  ;;  %v1118_v15 = vpop.xlane.xlu1 %1117  ;;  %v387_v21 = vpop.permute.xlu0 %386 }
 0x5e5   :  { %v1142_v37 = vsub.f32 %v3726_v9, %v1118_v15  ;;  %v392_v24 = vadd.f32 %v3468_v53, %v387_v21 }
 0x5e7   :  { %v3787_v25 = vpop.eup %3110  ;;  %v1165_v43 = vmul.f32 1.442695, %v1142_v37 }
 0x5e8   :  { %1187 = vadd.xlane.f32.xlu1 %v3787_v25  ;;  %v1116_v30 = vpop.xlane.xlu1 %1115 }
 0x5e9   :  { %3116 = vpow2.f32 %v1165_v43  ;;  %v1141_v26 = vsub.f32 %v3732_v16, %v1116_v30 }
 0x5eb   :  { %v3791_v20 = vpop.eup %3112  ;;  %v1163_v38 = vmul.f32 1.442695, %v1141_v26 }
 0x5ec   :  { %1193 = vadd.xlane.f32.xlu1 %v3791_v20  ;;  %v1122_v29 = vpop.xlane.xlu1 %1121  ;;  %v3795_v27 = vpop.eup %3114 }
 0x5ed   :  { %3118 = vpow2.f32 %v1163_v38  ;;  %v1144_v41 = vsub.f32 %v3735_v54, %v1122_v29 }
 0x5ef   :  { %v1169_v9 = vmul.f32 1.442695, %v1144_v41 }
 0x5f0   :  { %1191 = vadd.xlane.f32.xlu1 %v3795_v27  ;;  %v1120_v10 = vpop.xlane.xlu1 %1119 }
 0x5f1   :  { %3120 = vpow2.f32 %v1169_v9  ;;  %v1143_v32 = vsub.f32 %v3741_v42, %v1120_v10 }
 0x5f3   :  { %v3799_v18 = vpop.eup %3116  ;;  %v1167_v16 = vmul.f32 1.442695, %v1143_v32 }
 0x5f4   :  { %1197 = vadd.xlane.f32.xlu1 %v3799_v18  ;;  %v1126_v60 = vpop.xlane.xlu1 %1125 }
 0x5f5   :  { %3122 = vpow2.f32 %v1167_v16  ;;  %v1146_v58 = vsub.f32 %v3747_v28, %v1126_v60 }
 0x5f7   :  { %v3803_v46 = vpop.eup %3118  ;;  %v1173_v54 = vmul.f32 1.442695, %v1146_v58 }
 0x5f8   :  { %1195 = vadd.xlane.f32.xlu1 %v3803_v46  ;;  %v1124_v55 = vpop.xlane.xlu1 %1123 }
 0x5f9   :  { %3124 = vpow2.f32 %v1173_v54  ;;  %v1145_v51 = vsub.f32 %v3753_v45, %v1124_v55 }
 0x5fb   :  { %v3807_v52 = vpop.eup %3120  ;;  %v1171_v42 = vmul.f32 1.442695, %v1145_v51 }
 0x5fc   :  { %1201 = vadd.xlane.f32.xlu1 %v3807_v52  ;;  %v1130_v56 = vpop.xlane.xlu1 %1129 }
 0x5fd   :  { %3126 = vpow2.f32 %v1171_v42  ;;  %v1148_v1 = vsub.f32 %v3756_v36, %v1130_v56 }
 0x5ff   :  { %v3811_v22 = vpop.eup %3122  ;;  %v1177_v28 = vmul.f32 1.442695, %v1148_v1 }
 0x600   :  { %1199 = vadd.xlane.f32.xlu1 %v3811_v22  ;;  %v1128_v33 = vpop.xlane.xlu1 %1127 }
 0x601   :  { %3128 = vpow2.f32 %v1177_v28  ;;  %v1147_v5 = vsub.f32 %v3762_v39, %v1128_v33 }
 0x603   :  { %v3815_v49 = vpop.eup %3124  ;;  %v1175_v45 = vmul.f32 1.442695, %v1147_v5 }
 0x604   :  { %1205 = vadd.xlane.f32.xlu1 %v3815_v49  ;;  %v1134_v44 = vpop.xlane.xlu1 %1133 }
 0x605   :  { %3130 = vpow2.f32 %v1175_v45  ;;  %v1150_v40 = vsub.f32 %v3765_v4, %v1134_v44  ;;  %v367_v4 = vld [vmem:[%s4317_s4 + $0x10] sm:$0xff] }
 0x607   :  { %v3819_v11 = vpop.eup %3126  ;;  %v1181_v36 = vmul.f32 1.442695, %v1150_v40 }
 0x608   :  { %1203 = vadd.xlane.f32.xlu1 %v3819_v11  ;;  %v1132_v0 = vpop.xlane.xlu1 %1131 }
 0x609   :  { %3132 = vpow2.f32 %v1181_v36  ;;  %v1149_v48 = vsub.f32 %v3768_v47, %v1132_v0 }
 0x60b   :  { %v3822_v63 = vpop.eup %3128  ;;  %v1179_v19 = vmul.f32 1.442695, %v1149_v48 }
 0x60c   :  { %1209 = vadd.xlane.f32.xlu1 %v3822_v63 }
 0x60d   :  { %3134 = vpow2.f32 %v1179_v19 }
 0x60f   :  { %v3825_v39 = vpop.eup %3130 }
 0x610   :  { %1207 = vadd.xlane.f32.xlu1 %v3825_v39 }
 0x613   :  { %v3828_v17 = vpop.eup %3132 }
 0x614   :  { %1213 = vadd.xlane.f32.xlu0 %v3828_v17 }
 0x617   :  { %v3836_v6 = vpop.eup %3134 }
 0x621   :  { %381 = vperm.xlu1 %3025, %v367_v4  }
 0x641   :  { %1782 = vxpose.xlu0.b32.start.end [1/1] (short) %v392_v24, 128 }
 0x645   :  { %1211 = vadd.xlane.f32.xlu1 %v3836_v6 }
 0x669   :  { %v1186_v14 = vpop.xlane.xlu1 %1185 }
 0x66a   :  { %3136 = vrcp.f32 %v1186_v14 }
 0x66d   :  { %v1184_v8 = vpop.xlane.xlu1 %1183 }
 0x66e   :  { %3138 = vrcp.f32 %v1184_v8 }
 0x671   :  { %v1190_v13 = vpop.xlane.xlu1 %1189 }
 0x672   :  { %3140 = vrcp.f32 %v1190_v13 }
 0x674   :  { %v3137_v3 = vpop.eup %3136 }
 0x675   :  { %v1188_v31 = vpop.xlane.xlu1 %1187  ;;  %v1232_v53 = vmul.f32 %v3137_v3, %v3775_v7 }
 0x676   :  { %3142 = vrcp.f32 %v1188_v31 }
 0x678   :  { %v3139_v47 = vpop.eup %3138 }
 0x679   :  { %v1194_v35 = vpop.xlane.xlu1 %1193  ;;  %v1231_v15 = vmul.f32 %v3139_v47, %v3780_v34 }
 0x67a   :  { %3144 = vrcp.f32 %v1194_v35 }
 0x67b   :  { %v1248_v37 = vpack.c.bf16 %v1232_v53, %v1231_v15 }
 0x67c   :  { %v3141_v30 = vpop.eup %3140 }
 0x67d   :  { %2881 = vmatpush3.bf16.xpose.msra.mxu0 %v1248_v37  ;;  %v1192_v43 = vpop.xlane.xlu1 %1191  ;;  %v1234_v41 = vmul.f32 %v3141_v30, %v3783_v23 }
 0x67e   :  { %3146 = vrcp.f32 %v1192_v43  ;;  %2882 = vmatprep.subr.bf16.mxu0 %v3297_v12 }
 0x680   :  { %v3143_v26 = vpop.eup %3142 }
 0x681   :  { %v1198_v38 = vpop.xlane.xlu1 %1197  ;;  %v1233_v29 = vmul.f32 %v3143_v26, %v3787_v25  ;;  %v1247_v26 = vpack.c.bf16 %v3484_v62, %v3484_v62 }
 0x682   :  { %3148 = vrcp.f32 %v1198_v38 }
 0x683   :  { %v1249_v9 = vpack.c.bf16 %v1234_v41, %v1233_v29 }
 0x684   :  { %v3145_v10 = vpop.eup %3144 }
 0x685   :  { %2883 = vmatpush3.bf16.xpose.msra.mxu0 %v1249_v9  ;;  %v1196_v34 = vpop.xlane.xlu1 %1195  ;;  %v1236_v60 = vmul.f32 %v3145_v10, %v3791_v20 }
 0x686   :  { %3150 = vrcp.f32 %v1196_v34  ;;  %2884 = vmatprep.subr.bf16.mxu0 %v3297_v12 }
 0x688   :  { %v3147_v7 = vpop.eup %3146 }
 0x689   :  { %v1202_v32 = vpop.xlane.xlu1 %1201  ;;  %v1235_v16 = vmul.f32 %v3147_v7, %v3795_v27 }
 0x68a   :  { %3152 = vrcp.f32 %v1202_v32 }
 0x68b   :  { %v1250_v58 = vpack.c.bf16 %v1236_v60, %v1235_v16 }
 0x68c   :  { %v3149_v54 = vpop.eup %3148 }
 0x68d   :  { %2885 = vmatpush3.bf16.xpose.msra.mxu0 %v1250_v58  ;;  %v1200_v25 = vpop.xlane.xlu1 %1199  ;;  %v1238_v42 = vmul.f32 %v3149_v54, %v3799_v18 }
 0x68e   :  { %3154 = vrcp.f32 %v1200_v25  ;;  %2886 = vmatprep.subr.bf16.mxu0 %v3297_v12 }
 0x690   :  { %v3151_v23 = vpop.eup %3150 }
 0x691   :  { %v1206_v55 = vpop.xlane.xlu1 %1205  ;;  %v1237_v51 = vmul.f32 %v3151_v23, %v3803_v46 }
 0x692   :  { %3156 = vrcp.f32 %v1206_v55 }
 0x693   :  { %v1251_v56 = vpack.c.bf16 %v1238_v42, %v1237_v51 }
 0x694   :  { %v3153_v1 = vpop.eup %3152 }
 0x695   :  { %2887 = vmatpush3.bf16.xpose.msra.mxu0 %v1251_v56  ;;  %v1204_v27 = vpop.xlane.xlu1 %1203  ;;  %v1240_v5 = vmul.f32 %v3153_v1, %v3807_v52 }
 0x696   :  { %3158 = vrcp.f32 %v1204_v27  ;;  %2888 = vmatprep.subr.bf16.mxu0 %v3297_v12 }
 0x698   :  { %v3155_v20 = vpop.eup %3154 }
 0x699   :  { %v1210_v28 = vpop.xlane.xlu1 %1209  ;;  %v1239_v33 = vmul.f32 %v3155_v20, %v3811_v22 }
 0x69a   :  { %3160 = vrcp.f32 %v1210_v28 }
 0x69b   :  { %v1252_v45 = vpack.c.bf16 %v1240_v5, %v1239_v33 }
 0x69c   :  { %v3157_v44 = vpop.eup %3156 }
 0x69d   :  { %2889 = vmatpush3.bf16.xpose.msra.mxu0 %v1252_v45  ;;  %v1208_v46 = vpop.xlane.xlu1 %1207  ;;  %v1242_v4 = vmul.f32 %v3157_v44, %v3815_v49 }
 0x69e   :  { %3162 = vrcp.f32 %v1208_v46  ;;  %2890 = vmatprep.subr.bf16.mxu0 %v3297_v12 }
 0x6a0   :  { %v3159_v18 = vpop.eup %3158 }
 0x6a1   :  { %v382_v40 = vpop.permute.xlu1 %381  ;;  %v1241_v36 = vmul.f32 %v3159_v18, %v3819_v11  ;;  %v1214_v11 = vpop.xlane.xlu0 %1213 }
 0x6a2   :  { %v391_v0 = vadd.f32 %v3466_v50, %v382_v40  ;;  %3164 = vrcp.f32 %v1214_v11  ;;  %v2621_v11 = vld [vmem:[%s4318_s7 + $0x80] sm:$0xff]  }
 0x6a3   :  { %v1253_v48 = vpack.c.bf16 %v1242_v4, %v1241_v36 }
 0x6a4   :  { %1330 = vxpose.xlu1.b32.start.end [1/1] (short) %v391_v0, 128  ;;  %v3161_v52 = vpop.eup %3160 }
 0x6a5   :  { %2891 = vmatpush3.bf16.xpose.msra.mxu0 %v1253_v48  ;;  %v1244_v21 = vmul.f32 %v3161_v52, %v3822_v63 }
 0x6a6   :  { %2892 = vmatprep.subr.bf16.mxu0 %v3297_v12 }
 0x6a8   :  { %v3163_v22 = vpop.eup %3162 }
 0x6a9   :  { %v1243_v19 = vmul.f32 %v3163_v22, %v3825_v39 }
 0x6ab   :  { %v1254_v24 = vpack.c.bf16 %v1244_v21, %v1243_v19 }
 0x6ac   :  { %v3165_v35 = vpop.eup %3164 }
 0x6ad   :  { %2893 = vmatpush3.bf16.xpose.msra.mxu0 %v1254_v24  ;;  %v1246_v53 = vmul.f32 %v3165_v35, %v3828_v17  ;;  %v2622_v35 = vld [vmem:[%s4318_s7 + $0x88] sm:$0xff]  }
 0x6ae   :  { %2894 = vmatprep.subr.bf16.mxu0 %v3297_v12 }
 0x6c1   :  { %v1798_v14 = vpop.trf.xlu0 }
 0x6c5   :  { %v1799_v49 = vpop.trf.xlu0 }
 0x6c9   :  { %v1800_v8 = vpop.trf.xlu0 }
 0x6cd   :  { %v1801_v50 = vpop.trf.xlu0 }
 0x6d1   :  { %v1802_v13 = vpop.trf.xlu0 }
 0x6d2   :  { %v1212_v31 = vpop.xlane.xlu1 %1211 }
 0x6d3   :  { %3166 = vrcp.f32 %v1212_v31 }
 0x6d5   :  { %v1803_v3 = vpop.trf.xlu0 }
 0x6d9   :  { %v1804_v47 = vpop.trf.xlu0 }
 0x6dd   :  { %v3167_v15 = vpop.eup %3166  ;;  %v1805_v39 = vpop.trf.xlu0 }
 0x6de   :  { %v1245_v63 = vmul.f32 %v3167_v15, %v3836_v6 }
 0x6e0   :  { %v1255_v37 = vpack.c.bf16 %v1246_v53, %v1245_v63  ;;  %v2548_v53 = vunpack.c.l.bf16 %v2622_v35 }
 0x6e1   :  { %v1806_v43 = vpop.trf.xlu0 }
 0x6e2   :  { %2895 = vmatpush3.bf16.xpose.msra.mxu0 %v1255_v37  ;;  %v2549_v37 = vunpack.c.h.bf16 %v2622_v35 }
 0x6e3   :  { %2946 = vmatprep.subr.mxu0 %v3474_v57 }
 0x6e5   :  { %v1807_v30 = vpop.trf.xlu0 }
 0x6e9   :  { %2897 = vmatmul.mubr.bf16.vlgmr.msra.gmra.mrb[12].mxu0 %v1247_v26  ;;  %v1808_v38 = vpop.trf.xlu0 }
 0x6ea   :  { %2947 = vmatpush3.msra.mxu0 %v3474_v57  ;;  %2948 = vmatprep.mubr.msk.f32.mxu0 %vm457_vm2, %v1798_v14  ;;  %v2545_v14 = vunpack.c.h.bf16 %v2621_v11 }
 0x6eb   :  { %2972 = vmatprep.subr.bf16.mxu0 %v3297_v12 }
 0x6ed   :  { %v1809_v17 = vpop.trf.xlu0 }
 0x6f1   :  { %2949 = vmatmul.mubr.msk.f32.vlgmr.msra.gmra.mrb[16].mxu0 %vm457_vm2, %v1799_v49  ;;  %v1810_v6 = vpop.trf.xlu0  ;;  %v2629_v49 = vld [vmem:[%s4318_s7 + $0xc0] sm:$0xff]  }
 0x6f2   :  { %2951 = vmatprep.mubr.msk.f32.mxu0 %vm457_vm2, %v1800_v8  ;;  %v2544_v8 = vunpack.c.l.bf16 %v2621_v11  ;;  %v2576_v63 = vunpack.c.l.bf16 %v2629_v49 }
 0x6f5   :  { %2952 = vmatmul.mubr.msk.f32.gmra.mrb[18].mxu0 %vm457_vm2, %v1801_v50  ;;  %v1811_v57 = vpop.trf.xlu0 }
 0x6f6   :  { %2954 = vmatprep.mubr.msk.f32.mxu0 %vm457_vm2, %v1802_v13  ;;  %v2577_v13 = vunpack.c.h.bf16 %v2629_v49 }
 0x6f9   :  { %2955 = vmatmul.mubr.msk.f32.gmra.mrb[20].mxu0 %vm457_vm2, %v1803_v3  ;;  %v1812_v62 = vpop.trf.xlu0 }
 0x6fa   :  { %2957 = vmatprep.mubr.msk.f32.mxu0 %vm457_vm2, %v1804_v47 }
 0x6fd   :  { %2958 = vmatmul.mubr.msk.f32.gmra.mrb[22].mxu0 %vm457_vm2, %v1805_v39  ;;  %v1813_v29 = vpop.trf.xlu0  ;;  %v2630_v39 = vld [vmem:[%s4318_s7 + $0xc8] sm:$0xff]  }
 0x6fe   :  { %2960 = vmatprep.mubr.msk.f32.mxu0 %vm457_vm2, %v1806_v43 }
 0x701   :  { %2961 = vmatmul.mubr.msk.f32.gmra.mrb[24].mxu0 %vm457_vm2, %v1807_v30  ;;  %v2580_v30 = vunpack.c.l.bf16 %v2630_v39 }
 0x702   :  { %2963 = vmatprep.mubr.msk.f32.mxu0 %vm457_vm2, %v1808_v38 }
 0x705   :  { %2964 = vmatmul.mubr.msk.f32.gmra.mrb[26].mxu0 %vm457_vm2, %v1809_v17 }
 0x706   :  { %2966 = vmatprep.mubr.msk.f32.mxu0 %vm457_vm2, %v1810_v6  ;;  %v2623_v6 = vld [vmem:[%s4318_s7 + $0x90] sm:$0xff]  }
 0x709   :  { %2967 = vmatmul.mubr.msk.f32.gmra.mrb[28].mxu0 %vm457_vm2, %v1811_v57 }
 0x70a   :  { %2969 = vmatprep.mubr.msk.f32.mxu0 %vm457_vm2, %v1812_v62  ;;  %v2581_v62 = vunpack.c.h.bf16 %v2630_v39  ;;  %v2634_v39 = vld [vmem:[%s4318_s7 + $0xe8] sm:$0xff]  }
 0x70d   :  { %2970 = vmatmul.mubr.msk.f32.gmra.mrb[30].mxu0 %vm457_vm2, %v1813_v29 }
 0x70e   :  { %2988 = vmatprep.mubr.msk.bf16.mxu0 %vm3298_vm3, %v3297_v12 }
 0x724   :  { %v1346_v41 = vpop.trf.xlu1 }
 0x725   :  { %2902 = vmatprep.mubr.msk.f32.mxu1 %vm457_vm2, %v1346_v41  ;;  %v2631_v41 = vld [vmem:[%s4318_s7 + $0xd0] sm:$0xff]  }
 0x728   :  { %v1347_v9 = vpop.trf.xlu1 }
 0x729   :  { %2903 = vmatmul.mubr.msk.f32.vlgmr.msra.gmra.mrb[36].mxu1 %vm457_vm2, %v1347_v9  ;;  %v2552_v9 = vunpack.c.l.bf16 %v2623_v6 }
 0x72c   :  { %v1348_v34 = vpop.trf.xlu1 }
 0x72d   :  { %2905 = vmatprep.mubr.msk.f32.mxu1 %vm457_vm2, %v1348_v34 }
 0x730   :  { %v1349_v10 = vpop.trf.xlu1 }
 0x731   :  { %2906 = vmatmul.mubr.msk.f32.gmra.mrb[38].mxu1 %vm457_vm2, %v1349_v10  ;;  %v2553_v10 = vunpack.c.h.bf16 %v2623_v6 }
 0x734   :  { %v1350_v7 = vpop.trf.xlu1 }
 0x735   :  { %2908 = vmatprep.mubr.msk.f32.mxu1 %vm457_vm2, %v1350_v7 }
 0x738   :  { %v1351_v32 = vpop.trf.xlu1 }
 0x739   :  { %2909 = vmatmul.mubr.msk.f32.gmra.mrb[40].mxu1 %vm457_vm2, %v1351_v32  ;;  %v2584_v32 = vunpack.c.l.bf16 %v2631_v41 }
 0x73c   :  { %v1352_v16 = vpop.trf.xlu1 }
 0x73d   :  { %2911 = vmatprep.mubr.msk.f32.mxu1 %vm457_vm2, %v1352_v16 }
 0x740   :  { %v1353_v60 = vpop.trf.xlu1 }
 0x741   :  { %2912 = vmatmul.mubr.msk.f32.gmra.mrb[42].mxu1 %vm457_vm2, %v1353_v60 }
 0x744   :  { %v1354_v58 = vpop.trf.xlu1 }
 0x745   :  { %2914 = vmatprep.mubr.msk.f32.mxu1 %vm457_vm2, %v1354_v58  ;;  %v2624_v58 = vld [vmem:[%s4318_s7 + $0x98] sm:$0xff]  }
 0x748   :  { %v1355_v25 = vpop.trf.xlu1 }
 0x749   :  { %2915 = vmatmul.mubr.msk.f32.gmra.mrb[44].mxu1 %vm457_vm2, %v1355_v25 }
 0x74c   :  { %v1356_v54 = vpop.trf.xlu1 }
 0x74d   :  { %2917 = vmatprep.mubr.msk.f32.mxu1 %vm457_vm2, %v1356_v54  ;;  %v2585_v54 = vunpack.c.h.bf16 %v2631_v41  ;;  %v2597_v41 = vunpack.c.h.bf16 %v2634_v39 }
 0x750   :  { %v1357_v23 = vpop.trf.xlu1 }
 0x751   :  { %2918 = vmatmul.mubr.msk.f32.gmra.mrb[46].mxu1 %vm457_vm2, %v1357_v23 }
 0x754   :  { %v1358_v55 = vpop.trf.xlu1 }
 0x755   :  { %2920 = vmatprep.mubr.msk.f32.mxu1 %vm457_vm2, %v1358_v55  ;;  %v2632_v55 = vld [vmem:[%s4318_s7 + $0xd8] sm:$0xff]  }
 0x758   :  { %v1359_v51 = vpop.trf.xlu1 }
 0x759   :  { %2921 = vmatmul.mubr.msk.f32.gmra.mrb[48].mxu1 %vm457_vm2, %v1359_v51  ;;  %v2556_v51 = vunpack.c.l.bf16 %v2624_v58 }
 0x75c   :  { %v1360_v42 = vpop.trf.xlu1 }
 0x75d   :  { %2923 = vmatprep.mubr.msk.f32.mxu1 %vm457_vm2, %v1360_v42 }
 0x760   :  { %v1361_v56 = vpop.trf.xlu1 }
 0x761   :  { %2924 = vmatmul.mubr.msk.f32.gmra.mrb[50].mxu1 %vm457_vm2, %v1361_v56  ;;  %v2557_v56 = vunpack.c.h.bf16 %v2624_v58 }
 0x762   :  { %2942 = vmatprep.mubr.msk.bf16.mxu1 %vm3298_vm3, %v3297_v12 }
 0x7bc   :  { %v1290_v27 = vpop.f32.mrb[12].mxu0 }
 0x7bd   :  { %v3905_v1 = vpack.c.bf16 %v1290_v27, %v3694_v2  ;;  %v2898_v20 = vpop.f32.mrb[13].mxu0 }
 0x7be   :  { %v1293_v28 = vpop.f32.mrb[14].mxu0  ;;  %v2588_v20 = vunpack.c.l.bf16 %v2632_v55 }
 0x7bf   :  { %v2899_v33 = vpop.f32.mrb[15].mxu0 }
 0x7c4   :  { %v2950_v5 = vpop.f32.mrb[16].mxu0 }
 0x7c5   :  { %v1928_v45 = vpop.f32.mrb[17].mxu0  ;;  %v3942_v15 = vadd.f32 %v2950_v5, %v2577_v13  ;;  %v2625_v5 = vld [vmem:[%s4318_s7 + $0xa0] sm:$0xff]  }
 0x7c6   :  { %v3948_v38 = vadd.f32 %v2576_v63, %v1928_v45 }
 0x7c8   :  { %v2953_v46 = vpop.f32.mrb[18].mxu0 }
 0x7c9   :  { %v1938_v44 = vpop.f32.mrb[19].mxu0  ;;  %v3964_v34 = vadd.f32 %v2953_v46, %v2581_v62  ;;  %v2589_v46 = vunpack.c.h.bf16 %v2632_v55 }
 0x7ca   :  { %v3959_v29 = vadd.f32 %v2580_v30, %v1938_v44  ;;  %v2596_v30 = vunpack.c.l.bf16 %v2634_v39 }
 0x7cc   :  { %v2956_v18 = vpop.f32.mrb[20].mxu0 }
 0x7cd   :  { %v1948_v40 = vpop.f32.mrb[21].mxu0  ;;  %v3982_v42 = vadd.f32 %v2956_v18, %v2585_v54  ;;  %v2633_v18 = vld [vmem:[%s4318_s7 + $0xe0] sm:$0xff]  }
 0x7ce   :  { %v3977_v23 = vadd.f32 %v2584_v32, %v1948_v40  ;;  %v2560_v40 = vunpack.c.l.bf16 %v2625_v5  ;;  %v2593_v35 = vunpack.c.h.bf16 %v2633_v18 }
 0x7d0   :  { %v3907_v36 = vpop.f32.mrb[22].mxu0 }
 0x7d1   :  { %v3909_v4 = vpop.f32.mrb[23].mxu0  ;;  %v4002_v11 = vadd.f32 %v3907_v36, %v2589_v46 }
 0x7d2   :  { %v3996_v44 = vadd.f32 %v2588_v20, %v3909_v4  ;;  %v2626_v4 = vld [vmem:[%s4318_s7 + $0xa8] sm:$0xff]  }
 0x7d3   :  { %v2564_v63 = vunpack.c.l.bf16 %v2626_v4 }
 0x7d4   :  { %v3911_v0 = vpop.f32.mrb[24].mxu0 }
 0x7d5   :  { %v3913_v48 = vpop.f32.mrb[25].mxu0 }
 0x7d8   :  { %v3915_v52 = vpop.f32.mrb[26].mxu0 }
 0x7d9   :  { %v3917_v2 = vpop.f32.mrb[27].mxu0 }
 0x7dc   :  { %v3919_v22 = vpop.f32.mrb[28].mxu0 }
 0x7dd   :  { %v3921_v19 = vpop.f32.mrb[29].mxu0 }
 0x7e0   :  { %v3923_v21 = vpop.f32.mrb[30].mxu0 }
 0x7e1   :  { %v3925_v24 = vpop.f32.mrb[31].mxu0 }
 0x7fc   :  { %v2904_v50 = vpop.f32.mrb[36].mxu1 }
 0x7fd   :  { %v3933_v31 = vadd.f32 %v2904_v50, %v2545_v14  ;;  %v1476_v3 = vpop.f32.mrb[37].mxu1  ;;  %v2561_v14 = vunpack.c.h.bf16 %v2625_v5 }
 0x7fe   :  { %v3935_v47 = vadd.f32 %v2544_v8, %v1476_v3  ;;  %v2592_v8 = vunpack.c.l.bf16 %v2633_v18 }
 0x7ff   :  { %1557 = vmax.xlane.f32.xlu0 %v3933_v31 }
 0x800   :  { %1555 = vmax.xlane.f32.xlu1 %v3935_v47  ;;  %v4016_v36 = vadd.f32 %v2592_v8, %v3913_v48  ;;  %v2627_v48 = vld [vmem:[%s4318_s7 + $0xb0] sm:$0xff]  }
 0x801   :  { %v2569_v32 = vunpack.c.h.bf16 %v2627_v48 }
 0x804   :  { %v2907_v43 = vpop.f32.mrb[38].mxu1  ;;  %2009 = vmax.xlane.f32.xlu1 %v3942_v15 }
 0x805   :  { %v1486_v26 = vpop.f32.mrb[39].mxu1  ;;  %v3955_v57 = vadd.f32 %v2907_v43, %v2549_v37  ;;  %v2565_v37 = vunpack.c.h.bf16 %v2626_v4 }
 0x806   :  { %v3950_v17 = vadd.f32 %v2548_v53, %v1486_v26  ;;  %v4022_v53 = vadd.f32 %v3911_v0, %v2593_v35  ;;  %v4036_v0 = vadd.f32 %v2596_v30, %v3917_v2  ;;  %v2628_v2 = vld [vmem:[%s4318_s7 + $0xb8] sm:$0xff]  }
 0x807   :  { %v2572_v20 = vunpack.c.l.bf16 %v2628_v2  ;;  %v2573_v5 = vunpack.c.h.bf16 %v2628_v2 }
 0x808   :  { %1559 = vmax.xlane.f32.xlu0 %v3950_v17  ;;  %2007 = vmax.xlane.f32.xlu1 %v3948_v38 }
 0x80c   :  { %v2910_v7 = vpop.f32.mrb[40].mxu1  ;;  %2011 = vmax.xlane.f32.xlu0 %v3959_v29  ;;  %1561 = vmax.xlane.f32.xlu1 %v3955_v57 }
 0x80d   :  { %v1496_v16 = vpop.f32.mrb[41].mxu1  ;;  %v3973_v25 = vadd.f32 %v2910_v7, %v2553_v10  ;;  %v2568_v10 = vunpack.c.l.bf16 %v2627_v48  ;;  %v4042_v7 = vadd.f32 %v3915_v52, %v2597_v41 }
 0x80e   :  { %v3968_v60 = vadd.f32 %v2552_v9, %v1496_v16  ;;  %v2635_v9 = vld [vmem:[%s4318_s7 + $0xf0] sm:$0xff]  }
 0x80f   :  { %v2600_v58 = vunpack.c.l.bf16 %v2635_v9 }
 0x810   :  { %1563 = vmax.xlane.f32.xlu0 %v3968_v60  ;;  %2013 = vmax.xlane.f32.xlu1 %v3964_v34 }
 0x811   :  { %v4056_v52 = vadd.f32 %v2600_v58, %v3921_v19 }
 0x814   :  { %v2913_v27 = vpop.f32.mrb[42].mxu1  ;;  %2015 = vmax.xlane.f32.xlu0 %v3977_v23  ;;  %1565 = vmax.xlane.f32.xlu1 %v3973_v25 }
 0x815   :  { %v1506_v28 = vpop.f32.mrb[43].mxu1  ;;  %v3991_v45 = vadd.f32 %v2913_v27, %v2557_v56  ;;  %v2601_v56 = vunpack.c.h.bf16 %v2635_v9  ;;  %v2636_v27 = vld [vmem:[%s4318_s7 + $0xf8] sm:$0xff]  }
 0x816   :  { %v3986_v33 = vadd.f32 %v2556_v51, %v1506_v28  ;;  %v2604_v18 = vunpack.c.l.bf16 %v2636_v27 }
 0x817   :  { %v4062_v28 = vadd.f32 %v3919_v22, %v2601_v56 }
 0x818   :  { %1567 = vmax.xlane.f32.xlu0 %v3986_v33  ;;  %2017 = vmax.xlane.f32.xlu1 %v3982_v42  ;;  %v4073_v22 = vadd.f32 %v2604_v18, %v3925_v24 }
 0x81c   :  { %v2916_v49 = vpop.f32.mrb[44].mxu1  ;;  %2019 = vmax.xlane.f32.xlu0 %v3996_v44  ;;  %1569 = vmax.xlane.f32.xlu1 %v3991_v45 }
 0x81d   :  { %v1516_v50 = vpop.f32.mrb[45].mxu1  ;;  %v4011_v3 = vadd.f32 %v2916_v49, %v2561_v14  ;;  %v2605_v49 = vunpack.c.h.bf16 %v2636_v27 }
 0x81e   :  { %v4006_v13 = vadd.f32 %v2560_v40, %v1516_v50 }
 0x81f   :  { %v4076_v8 = vadd.f32 %v3923_v21, %v2605_v49 }
 0x820   :  { %1571 = vmax.xlane.f32.xlu0 %v4006_v13  ;;  %2021 = vmax.xlane.f32.xlu1 %v4002_v11 }
 0x824   :  { %v2919_v43 = vpop.f32.mrb[46].mxu1  ;;  %2023 = vmax.xlane.f32.xlu0 %v4016_v36  ;;  %1573 = vmax.xlane.f32.xlu1 %v4011_v3 }
 0x825   :  { %v1526_v26 = vpop.f32.mrb[47].mxu1  ;;  %v4031_v62 = vadd.f32 %v2919_v43, %v2565_v37 }
 0x826   :  { %v4026_v6 = vadd.f32 %v2564_v63, %v1526_v26 }
 0x828   :  { %1575 = vmax.xlane.f32.xlu0 %v4026_v6  ;;  %2025 = vmax.xlane.f32.xlu1 %v4022_v53 }
 0x82c   :  { %v2922_v16 = vpop.f32.mrb[48].mxu1  ;;  %2027 = vmax.xlane.f32.xlu0 %v4036_v0  ;;  %1577 = vmax.xlane.f32.xlu1 %v4031_v62 }
 0x82d   :  { %v1536_v54 = vpop.f32.mrb[49].mxu1  ;;  %v4051_v51 = vadd.f32 %v2922_v16, %v2569_v32 }
 0x82e   :  { %v4046_v55 = vadd.f32 %v2568_v10, %v1536_v54 }
 0x830   :  { %1579 = vmax.xlane.f32.xlu0 %v4046_v55  ;;  %2029 = vmax.xlane.f32.xlu1 %v4042_v7 }
 0x834   :  { %v2925_v46 = vpop.f32.mrb[50].mxu1  ;;  %2031 = vmax.xlane.f32.xlu0 %v4056_v52  ;;  %1581 = vmax.xlane.f32.xlu1 %v4051_v51 }
 0x835   :  { %v1546_v40 = vpop.f32.mrb[51].mxu1  ;;  %v4068_v19 = vadd.f32 %v2925_v46, %v2573_v5 }
 0x836   :  { %v4066_v14 = vadd.f32 %v2572_v20, %v1546_v40 }
 0x838   :  { %1583 = vmax.xlane.f32.xlu0 %v4066_v14  ;;  %2033 = vmax.xlane.f32.xlu1 %v4062_v28 }
 0x83c   :  { %2035 = vmax.xlane.f32.xlu0 %v4073_v22  ;;  %1585 = vmax.xlane.f32.xlu1 %v4068_v19 }
 0x840   :  { %2037 = vmax.xlane.f32.xlu1 %v4076_v8 }
 0x88c   :  { %v1558_v50 = vpop.xlane.xlu0 %1557 }
 0x88d   :  { %v1588_v4 = vsub.f32 %v3933_v31, %v1558_v50  ;;  %v1556_v35 = vpop.xlane.xlu1 %1555 }
 0x88e   :  { %v1587_v39 = vsub.f32 %v3935_v47, %v1556_v35 }
 0x88f   :  { %v1605_v63 = vmul.f32 1.442695, %v1588_v4 }
 0x890   :  { %v1603_v37 = vmul.f32 1.442695, %v1587_v39 }
 0x891   :  { %3168 = vpow2.f32 %v1605_v63  ;;  %v2010_v24 = vpop.xlane.xlu1 %2009 }
 0x892   :  { %3170 = vpow2.f32 %v1603_v37  ;;  %v2040_v21 = vsub.f32 %v3942_v15, %v2010_v24 }
 0x894   :  { %v2057_v43 = vmul.f32 1.442695, %v2040_v21 }
 0x895   :  { %v1560_v30 = vpop.xlane.xlu0 %1559  ;;  %v2008_v26 = vpop.xlane.xlu1 %2007 }
 0x896   :  { %3172 = vpow2.f32 %v2057_v43  ;;  %v1589_v48 = vsub.f32 %v3950_v17, %v1560_v30  ;;  %v2039_v41 = vsub.f32 %v3948_v38, %v2008_v26 }
 0x898   :  { %v2055_v9 = vmul.f32 1.442695, %v2039_v41  ;;  %v1607_v32 = vmul.f32 1.442695, %v1589_v48 }
 0x899   :  { %v2012_v31 = vpop.xlane.xlu0 %2011  ;;  %v1562_v10 = vpop.xlane.xlu1 %1561 }
 0x89a   :  { %v2041_v47 = vsub.f32 %v3959_v29, %v2012_v31  ;;  %v1590_v16 = vsub.f32 %v3955_v57, %v1562_v10  ;;  %3174 = vpow2.f32 %v2055_v9 }
 0x89b   :  { %v4088_v58 = vpop.eup %3168  ;;  %3176 = vpow2.f32 %v1607_v32 }
 0x89c   :  { %v4090_v15 = vpop.eup %3170  ;;  %v1609_v54 = vmul.f32 1.442695, %v1590_v16  ;;  %1637 = vadd.xlane.f32.xlu1 %v4088_v58  ;;  %v2059_v2 = vmul.f32 1.442695, %v2041_v47 }
 0x89d   :  { %1635 = vadd.xlane.f32.xlu0 %v4090_v15  ;;  %v1564_v17 = vpop.xlane.xlu0 %1563  ;;  %v2014_v38 = vpop.xlane.xlu1 %2013 }
 0x89e   :  { %v1591_v56 = vsub.f32 %v3968_v60, %v1564_v17  ;;  %v2042_v29 = vsub.f32 %v3964_v34, %v2014_v38  ;;  %3178 = vpow2.f32 %v1609_v54 }
 0x89f   :  { %3180 = vpow2.f32 %v2059_v2 }
 0x8a0   :  { %v4096_v57 = vpop.eup %3172  ;;  %v2061_v27 = vmul.f32 1.442695, %v2042_v29  ;;  %v1611_v46 = vmul.f32 1.442695, %v1591_v56 }
 0x8a1   :  { %v2016_v20 = vpop.xlane.xlu0 %2015  ;;  %2089 = vadd.xlane.f32.xlu1 %v4096_v57  ;;  %v1566_v5 = vpop.xlane.xlu1 %1565 }
 0x8a2   :  { %v2043_v18 = vsub.f32 %v3977_v23, %v2016_v20  ;;  %v1592_v40 = vsub.f32 %v3973_v25, %v1566_v5  ;;  %3182 = vpow2.f32 %v2061_v27 }
 0x8a3   :  { %3184 = vpow2.f32 %v1611_v46 }
 0x8a4   :  { %v1613_v49 = vmul.f32 1.442695, %v1592_v40  ;;  %v4101_v50 = vpop.eup %3174  ;;  %v2063_v4 = vmul.f32 1.442695, %v2043_v18 }
 0x8a5   :  { %v1568_v60 = vpop.xlane.xlu0 %1567  ;;  %v2018_v34 = vpop.xlane.xlu1 %2017  ;;  %2087 = vadd.xlane.f32.xlu0 %v4101_v50 }
 0x8a6   :  { %v1593_v35 = vsub.f32 %v3986_v33, %v1568_v60  ;;  %v2044_v39 = vsub.f32 %v3982_v42, %v2018_v34  ;;  %3186 = vpow2.f32 %v1613_v49  ;;  %v4106_v63 = vpop.eup %3176 }
 0x8a7   :  { %3188 = vpow2.f32 %v2063_v4 }
 0x8a8   :  { %v2065_v23 = vmul.f32 1.442695, %v2044_v39  ;;  %v4108_v37 = vpop.eup %3178  ;;  %v1615_v21 = vmul.f32 1.442695, %v1593_v35 }
 0x8a9   :  { %v2020_v25 = vpop.xlane.xlu0 %2019  ;;  %v1570_v24 = vpop.xlane.xlu1 %1569  ;;  %1639 = vadd.xlane.f32.xlu0 %v4106_v63  ;;  %1641 = vadd.xlane.f32.xlu1 %v4108_v37 }
 0x8aa   :  { %v2045_v43 = vsub.f32 %v3996_v44, %v2020_v25  ;;  %v1594_v33 = vsub.f32 %v3991_v45, %v1570_v24  ;;  %3190 = vpow2.f32 %v2065_v23  ;;  %v4114_v42 = vpop.eup %3180 }
 0x8ab   :  { %3192 = vpow2.f32 %v1615_v21 }
 0x8ac   :  { %v1617_v30 = vmul.f32 1.442695, %v1594_v33  ;;  %v4116_v26 = vpop.eup %3182  ;;  %v2067_v9 = vmul.f32 1.442695, %v2045_v43 }
 0x8ad   :  { %v1572_v48 = vpop.xlane.xlu0 %1571  ;;  %v2022_v41 = vpop.xlane.xlu1 %2021  ;;  %2091 = vadd.xlane.f32.xlu0 %v4114_v42  ;;  %2093 = vadd.xlane.f32.xlu1 %v4116_v26 }
 0x8ae   :  { %v1595_v31 = vsub.f32 %v4006_v13, %v1572_v48  ;;  %v2046_v44 = vsub.f32 %v4002_v11, %v2022_v41  ;;  %3194 = vpow2.f32 %v1617_v30  ;;  %v4122_v45 = vpop.eup %3184 }
 0x8af   :  { %3196 = vpow2.f32 %v2067_v9 }
 0x8b0   :  { %v2069_v10 = vmul.f32 1.442695, %v2046_v44  ;;  %v4124_v32 = vpop.eup %3186  ;;  %v1619_v54 = vmul.f32 1.442695, %v1595_v31 }
 0x8b1   :  { %v2024_v47 = vpop.xlane.xlu0 %2023  ;;  %v1574_v16 = vpop.xlane.xlu1 %1573  ;;  %1643 = vadd.xlane.f32.xlu0 %v4122_v45  ;;  %1645 = vadd.xlane.f32.xlu1 %v4124_v32 }
 0x8b2   :  { %v2047_v17 = vsub.f32 %v4016_v36, %v2024_v47  ;;  %v1596_v13 = vsub.f32 %v4011_v3, %v1574_v16  ;;  %3198 = vpow2.f32 %v2069_v10  ;;  %v4130_v11 = vpop.eup %3188 }
 0x8b3   :  { %3200 = vpow2.f32 %v1619_v54 }
 0x8b4   :  { %v1621_v38 = vmul.f32 1.442695, %v1596_v13  ;;  %v4132_v2 = vpop.eup %3190  ;;  %v2071_v27 = vmul.f32 1.442695, %v2047_v17 }
 0x8b5   :  { %v1576_v56 = vpop.xlane.xlu0 %1575  ;;  %v2026_v29 = vpop.xlane.xlu1 %2025  ;;  %2095 = vadd.xlane.f32.xlu0 %v4130_v11  ;;  %2097 = vadd.xlane.f32.xlu1 %v4132_v2 }
 0x8b6   :  { %v1597_v20 = vsub.f32 %v4026_v6, %v1576_v56  ;;  %v2048_v36 = vsub.f32 %v4022_v53, %v2026_v29  ;;  %3202 = vpow2.f32 %v1621_v38  ;;  %v4138_v3 = vpop.eup %3192 }
 0x8b7   :  { %3204 = vpow2.f32 %v2071_v27 }
 0x8b8   :  { %v2073_v5 = vmul.f32 1.442695, %v2048_v36  ;;  %v4140_v46 = vpop.eup %3194  ;;  %v1623_v49 = vmul.f32 1.442695, %v1597_v20 }
 0x8b9   :  { %v2028_v18 = vpop.xlane.xlu0 %2027  ;;  %v1578_v40 = vpop.xlane.xlu1 %1577  ;;  %1647 = vadd.xlane.f32.xlu0 %v4138_v3  ;;  %1649 = vadd.xlane.f32.xlu1 %v4140_v46 }
 0x8ba   :  { %v2049_v60 = vsub.f32 %v4036_v0, %v2028_v18  ;;  %v1598_v6 = vsub.f32 %v4031_v62, %v1578_v40  ;;  %3206 = vpow2.f32 %v2073_v5  ;;  %v4146_v53 = vpop.eup %3196 }
 0x8bb   :  { %3208 = vpow2.f32 %v1623_v49 }
 0x8bc   :  { %v1625_v34 = vmul.f32 1.442695, %v1598_v6  ;;  %v4148_v4 = vpop.eup %3198  ;;  %v2075_v23 = vmul.f32 1.442695, %v2049_v60 }
 0x8bd   :  { %v1580_v35 = vpop.xlane.xlu0 %1579  ;;  %v2030_v39 = vpop.xlane.xlu1 %2029  ;;  %2099 = vadd.xlane.f32.xlu0 %v4146_v53  ;;  %2101 = vadd.xlane.f32.xlu1 %v4148_v4 }
 0x8be   :  { %v1599_v25 = vsub.f32 %v4046_v55, %v1580_v35  ;;  %v2050_v0 = vsub.f32 %v4042_v7, %v2030_v39  ;;  %3210 = vpow2.f32 %v1625_v34  ;;  %v4154_v62 = vpop.eup %3200  ;;  %v2212_v35 = vld [vmem:[%s4319_s6 + $0x8] sm:$0xff]  ;;  %v2213_v39 = vld [vmem:[%s4319_s6 + $0x10] sm:$0xff] }
 0x8bf   :  { %3212 = vpow2.f32 %v2075_v23  ;;  %v2211_v23 = vld [vmem:[%s4319_s6] sm:$0xff] }
 0x8c0   :  { %v2077_v24 = vmul.f32 1.442695, %v2050_v0  ;;  %v4156_v21 = vpop.eup %3202  ;;  %v1627_v30 = vmul.f32 1.442695, %v1599_v25  ;;  %v2214_v25 = vld [vmem:[%s4319_s6 + $0x18] sm:$0xff] }
 0x8c1   :  { %v2032_v43 = vpop.xlane.xlu0 %2031  ;;  %v1582_v33 = vpop.xlane.xlu1 %1581  ;;  %1651 = vadd.xlane.f32.xlu0 %v4154_v62  ;;  %1653 = vadd.xlane.f32.xlu1 %v4156_v21 }
 0x8c2   :  { %v2051_v48 = vsub.f32 %v4056_v52, %v2032_v43  ;;  %v1600_v55 = vsub.f32 %v4051_v51, %v1582_v33  ;;  %3214 = vpow2.f32 %v2077_v24  ;;  %v4162_v7 = vpop.eup %3204 }
 0x8c3   :  { %3216 = vpow2.f32 %v1627_v30 }
 0x8c4   :  { %v1629_v41 = vmul.f32 1.442695, %v1600_v55  ;;  %v4164_v9 = vpop.eup %3206  ;;  %v2079_v10 = vmul.f32 1.442695, %v2051_v48 }
 0x8c5   :  { %v1584_v31 = vpop.xlane.xlu0 %1583  ;;  %v2034_v44 = vpop.xlane.xlu1 %2033  ;;  %2103 = vadd.xlane.f32.xlu0 %v4162_v7  ;;  %2105 = vadd.xlane.f32.xlu1 %v4164_v9 }
 0x8c6   :  { %v1601_v47 = vsub.f32 %v4066_v14, %v1584_v31  ;;  %v2052_v52 = vsub.f32 %v4062_v28, %v2034_v44  ;;  %3218 = vpow2.f32 %v1629_v41  ;;  %v4170_v51 = vpop.eup %3208 }
 0x8c7   :  { %3220 = vpow2.f32 %v2079_v10 }
 0x8c8   :  { %v2081_v16 = vmul.f32 1.442695, %v2052_v52  ;;  %v4172_v54 = vpop.eup %3210  ;;  %v1631_v38 = vmul.f32 1.442695, %v1601_v47 }
 0x8c9   :  { %v2036_v17 = vpop.xlane.xlu0 %2035  ;;  %v1586_v13 = vpop.xlane.xlu1 %1585  ;;  %1655 = vadd.xlane.f32.xlu0 %v4170_v51  ;;  %1657 = vadd.xlane.f32.xlu1 %v4172_v54 }
 0x8ca   :  { %v1602_v14 = vsub.f32 %v4068_v19, %v1586_v13  ;;  %3222 = vpow2.f32 %v2081_v16  ;;  %v2053_v56 = vsub.f32 %v4073_v22, %v2036_v17  ;;  %v4178_v28 = vpop.eup %3212 }
 0x8cb   :  { %3224 = vpow2.f32 %v1631_v38 }
 0x8cc   :  { %v1633_v29 = vmul.f32 1.442695, %v1602_v14  ;;  %v4180_v27 = vpop.eup %3214  ;;  %v2083_v5 = vmul.f32 1.442695, %v2053_v56 }
 0x8cd   :  { %v2038_v20 = vpop.xlane.xlu1 %2037  ;;  %2107 = vadd.xlane.f32.xlu0 %v4178_v28  ;;  %2109 = vadd.xlane.f32.xlu1 %v4180_v27  ;;  %v4185_v18 = vpop.eup %3216 }
 0x8ce   :  { %v2054_v36 = vsub.f32 %v4076_v8, %v2038_v20  ;;  %3226 = vpow2.f32 %v1633_v29 }
 0x8d0   :  { %v2085_v19 = vmul.f32 1.442695, %v2054_v36  ;;  %v4187_v40 = vpop.eup %3218 }
 0x8d1   :  { %1659 = vadd.xlane.f32.xlu0 %v4185_v18  ;;  %1661 = vadd.xlane.f32.xlu1 %v4187_v40  ;;  %v4191_v22 = vpop.eup %3220 }
 0x8d2   :  { %3228 = vpow2.f32 %v2085_v19 }
 0x8d3   :  { %3230 = vpow2.f32 %v2083_v5 }
 0x8d4   :  { %v4193_v49 = vpop.eup %3222 }
 0x8d5   :  { %2111 = vadd.xlane.f32.xlu0 %v4191_v22  ;;  %2113 = vadd.xlane.f32.xlu1 %v4193_v49  ;;  %v4197_v8 = vpop.eup %3224 }
 0x8d8   :  { %v4199_v60 = vpop.eup %3226 }
 0x8d9   :  { %1663 = vadd.xlane.f32.xlu0 %v4197_v8  ;;  %1665 = vadd.xlane.f32.xlu1 %v4199_v60 }
 0x8dc   :  { %v4203_v6 = vpop.eup %3228 }
 0x8dd   :  { %v4205_v34 = vpop.eup %3230  ;;  %2117 = vadd.xlane.f32.xlu1 %v4203_v6 }
 0x8de   :  { %2115 = vadd.xlane.f32.xlu0 %v4205_v34 }
 0x8ee   :  { %2222 = vperm.xlu1 %3025, %v2212_v35  }
 0x8f2   :  { %2227 = vperm.xlu1 %3025, %v2213_v39  }
 0x8f4   :  { %2217 = vperm.xlu0 %3024, %v2211_v23  }
 0x8f6   :  { %2232 = vperm.xlu1 %3025, %v2214_v25  }
 0x929   :  { %v1638_v0 = vpop.xlane.xlu1 %1637 }
 0x92a   :  { %3232 = vrcp.f32 %v1638_v0  ;;  %v1636_v24 = vpop.xlane.xlu0 %1635 }
 0x92b   :  { %3234 = vrcp.f32 %v1636_v24 }
 0x92e   :  { %v2090_v43 = vpop.xlane.xlu1 %2089 }
 0x92f   :  { %3236 = vrcp.f32 %v2090_v43 }
 0x932   :  { %v2088_v33 = vpop.xlane.xlu0 %2087 }
 0x933   :  { %3238 = vrcp.f32 %v2088_v33 }
 0x934   :  { %v3233_v30 = vpop.eup %3232 }
 0x935   :  { %v3235_v48 = vpop.eup %3234  ;;  %v1684_v55 = vmul.f32 %v3233_v30, %v4088_v58 }
 0x936   :  { %v1683_v41 = vmul.f32 %v3235_v48, %v4090_v15  ;;  %v1640_v31 = vpop.xlane.xlu0 %1639  ;;  %v1642_v44 = vpop.xlane.xlu1 %1641 }
 0x937   :  { %3240 = vrcp.f32 %v1640_v31 }
 0x938   :  { %v1700_v10 = vpack.c.bf16 %v1684_v55, %v1683_v41  ;;  %3242 = vrcp.f32 %v1642_v44 }
 0x939   :  { %v3237_v16 = vpop.eup %3236 }
 0x93a   :  { %2927 = vmatpush3.bf16.xpose.msra.mxu1 %v1700_v10  ;;  %v2092_v47 = vpop.xlane.xlu0 %2091  ;;  %v2094_v52 = vpop.xlane.xlu1 %2093  ;;  %v2136_v15 = vmul.f32 %v3237_v16, %v4096_v57 }
 0x93b   :  { %2928 = vmatprep.subr.bf16.mxu1 %v3297_v12  ;;  %3244 = vrcp.f32 %v2092_v47 }
 0x93c   :  { %3246 = vrcp.f32 %v2094_v52 }
 0x93d   :  { %v3239_v17 = vpop.eup %3238 }
 0x93e   :  { %v1644_v13 = vpop.xlane.xlu0 %1643  ;;  %v1646_v38 = vpop.xlane.xlu1 %1645  ;;  %v2135_v58 = vmul.f32 %v3239_v17, %v4101_v50 }
 0x93f   :  { %3248 = vrcp.f32 %v1644_v13 }
 0x940   :  { %3250 = vrcp.f32 %v1646_v38  ;;  %v2152_v14 = vpack.c.bf16 %v2136_v15, %v2135_v58 }
 0x941   :  { %v3241_v56 = vpop.eup %3240 }
 0x942   :  { %v3243_v29 = vpop.eup %3242  ;;  %v2096_v20 = vpop.xlane.xlu0 %2095  ;;  %2973 = vmatpush3.bf16.xpose.msra.mxu0 %v2152_v14  ;;  %v1685_v5 = vmul.f32 %v3241_v56, %v4106_v63 }
 0x943   :  { %v2098_v36 = vpop.xlane.xlu1 %2097  ;;  %3252 = vrcp.f32 %v2096_v20  ;;  %v1686_v19 = vmul.f32 %v3243_v29, %v4108_v37  ;;  %2974 = vmatprep.subr.bf16.mxu0 %v3297_v12 }
 0x944   :  { %3254 = vrcp.f32 %v2098_v36 }
 0x945   :  { %v3245_v35 = vpop.eup %3244  ;;  %v1701_v50 = vpack.c.bf16 %v1686_v19, %v1685_v5 }
 0x946   :  { %v3247_v39 = vpop.eup %3246  ;;  %v1648_v57 = vpop.xlane.xlu0 %1647  ;;  %v2137_v25 = vmul.f32 %v3245_v35, %v4114_v42 }
 0x947   :  { %v1650_v23 = vpop.xlane.xlu1 %1649  ;;  %3256 = vrcp.f32 %v1648_v57  ;;  %2929 = vmatpush3.bf16.xpose.msra.mxu1 %v1701_v50  ;;  %v2138_v0 = vmul.f32 %v3247_v39, %v4116_v26 }
 0x948   :  { %3258 = vrcp.f32 %v1650_v23  ;;  %2930 = vmatprep.subr.bf16.mxu1 %v3297_v12 }
 0x949   :  { %v3249_v63 = vpop.eup %3248  ;;  %v2153_v24 = vpack.c.bf16 %v2138_v0, %v2137_v25 }
 0x94a   :  { %v3251_v37 = vpop.eup %3250  ;;  %v2100_v43 = vpop.xlane.xlu0 %2099  ;;  %v1687_v30 = vmul.f32 %v3249_v63, %v4122_v45 }
 0x94b   :  { %v2102_v33 = vpop.xlane.xlu1 %2101  ;;  %3260 = vrcp.f32 %v2100_v43  ;;  %2975 = vmatpush3.bf16.xpose.msra.mxu0 %v2153_v24  ;;  %v1688_v48 = vmul.f32 %v3251_v37, %v4124_v32 }
 0x94c   :  { %3262 = vrcp.f32 %v2102_v33  ;;  %2976 = vmatprep.subr.bf16.mxu0 %v3297_v12 }
 0x94d   :  { %v3253_v42 = vpop.eup %3252  ;;  %v1702_v55 = vpack.c.bf16 %v1688_v48, %v1687_v30 }
 0x94e   :  { %v3255_v26 = vpop.eup %3254  ;;  %v1652_v41 = vpop.xlane.xlu0 %1651  ;;  %v2139_v44 = vmul.f32 %v3253_v42, %v4130_v11 }
 0x94f   :  { %v1654_v31 = vpop.xlane.xlu1 %1653  ;;  %3264 = vrcp.f32 %v1652_v41  ;;  %2931 = vmatpush3.bf16.xpose.msra.mxu1 %v1702_v55  ;;  %v2140_v10 = vmul.f32 %v3255_v26, %v4132_v2 }
 0x950   :  { %3266 = vrcp.f32 %v1654_v31  ;;  %2932 = vmatprep.subr.bf16.mxu1 %v3297_v12 }
 0x951   :  { %v3257_v45 = vpop.eup %3256  ;;  %v2154_v47 = vpack.c.bf16 %v2140_v10, %v2139_v44 }
 0x952   :  { %v3259_v32 = vpop.eup %3258  ;;  %v2104_v52 = vpop.xlane.xlu0 %2103  ;;  %v1689_v17 = vmul.f32 %v3257_v45, %v4138_v3 }
 0x953   :  { %v2106_v16 = vpop.xlane.xlu1 %2105  ;;  %3268 = vrcp.f32 %v2104_v52  ;;  %2977 = vmatpush3.bf16.xpose.msra.mxu0 %v2154_v47  ;;  %v1690_v13 = vmul.f32 %v3259_v32, %v4140_v46 }
 0x954   :  { %3270 = vrcp.f32 %v2106_v16  ;;  %2978 = vmatprep.subr.bf16.mxu0 %v3297_v12 }
 0x955   :  { %v3261_v11 = vpop.eup %3260  ;;  %v1703_v38 = vpack.c.bf16 %v1690_v13, %v1689_v17 }
 0x956   :  { %v3263_v2 = vpop.eup %3262  ;;  %v1656_v58 = vpop.xlane.xlu0 %1655  ;;  %v2141_v14 = vmul.f32 %v3261_v11, %v4146_v53 }
 0x957   :  { %v1658_v15 = vpop.xlane.xlu1 %1657  ;;  %3272 = vrcp.f32 %v1656_v58  ;;  %2933 = vmatpush3.bf16.xpose.msra.mxu1 %v1703_v38  ;;  %v2142_v56 = vmul.f32 %v3263_v2, %v4148_v4 }
 0x958   :  { %3274 = vrcp.f32 %v1658_v15  ;;  %2934 = vmatprep.subr.bf16.mxu1 %v3297_v12 }
 0x959   :  { %v3265_v3 = vpop.eup %3264  ;;  %v2155_v29 = vpack.c.bf16 %v2142_v56, %v2141_v14 }
 0x95a   :  { %v3267_v46 = vpop.eup %3266  ;;  %v2108_v20 = vpop.xlane.xlu0 %2107  ;;  %v1691_v5 = vmul.f32 %v3265_v3, %v4154_v62 }
 0x95b   :  { %v2110_v36 = vpop.xlane.xlu1 %2109  ;;  %3276 = vrcp.f32 %v2108_v20  ;;  %2979 = vmatpush3.bf16.xpose.msra.mxu0 %v2155_v29  ;;  %v1692_v19 = vmul.f32 %v3267_v46, %v4156_v21 }
 0x95c   :  { %3278 = vrcp.f32 %v2110_v36  ;;  %2980 = vmatprep.subr.bf16.mxu0 %v3297_v12 }
 0x95d   :  { %v3269_v53 = vpop.eup %3268  ;;  %v1704_v35 = vpack.c.bf16 %v1692_v19, %v1691_v5 }
 0x95e   :  { %v3271_v4 = vpop.eup %3270  ;;  %v1660_v50 = vpop.xlane.xlu0 %1659  ;;  %v2143_v57 = vmul.f32 %v3269_v53, %v4162_v7 }
 0x95f   :  { %v1662_v39 = vpop.xlane.xlu1 %1661  ;;  %3280 = vrcp.f32 %v1660_v50  ;;  %2935 = vmatpush3.bf16.xpose.msra.mxu1 %v1704_v35  ;;  %v2144_v23 = vmul.f32 %v3271_v4, %v4164_v9 }
 0x960   :  { %3282 = vrcp.f32 %v1662_v39  ;;  %2936 = vmatprep.subr.bf16.mxu1 %v3297_v12 }
 0x961   :  { %v3273_v62 = vpop.eup %3272  ;;  %v2156_v25 = vpack.c.bf16 %v2144_v23, %v2143_v57 }
 0x962   :  { %v3275_v21 = vpop.eup %3274  ;;  %v2112_v0 = vpop.xlane.xlu0 %2111  ;;  %v1693_v24 = vmul.f32 %v3273_v62, %v4170_v51 }
 0x963   :  { %v2114_v63 = vpop.xlane.xlu1 %2113  ;;  %3284 = vrcp.f32 %v2112_v0  ;;  %2981 = vmatpush3.bf16.xpose.msra.mxu0 %v2156_v25  ;;  %v1694_v37 = vmul.f32 %v3275_v21, %v4172_v54 }
 0x964   :  { %3286 = vrcp.f32 %v2114_v63  ;;  %2982 = vmatprep.subr.bf16.mxu0 %v3297_v12 }
 0x965   :  { %v3277_v7 = vpop.eup %3276  ;;  %v1705_v43 = vpack.c.bf16 %v1694_v37, %v1693_v24 }
 0x966   :  { %v3279_v9 = vpop.eup %3278  ;;  %v1664_v33 = vpop.xlane.xlu0 %1663  ;;  %v2145_v48 = vmul.f32 %v3277_v7, %v4178_v28 }
 0x967   :  { %v1666_v30 = vpop.xlane.xlu1 %1665  ;;  %3288 = vrcp.f32 %v1664_v33  ;;  %2937 = vmatpush3.bf16.xpose.msra.mxu1 %v1705_v43  ;;  %v2146_v42 = vmul.f32 %v3279_v9, %v4180_v27 }
 0x968   :  { %3290 = vrcp.f32 %v1666_v30  ;;  %2938 = vmatprep.subr.bf16.mxu1 %v3297_v12 }
 0x969   :  { %v3281_v51 = vpop.eup %3280  ;;  %v2157_v55 = vpack.c.bf16 %v2146_v42, %v2145_v48 }
 0x96a   :  { %v3283_v54 = vpop.eup %3282  ;;  %v1695_v31 = vmul.f32 %v3281_v51, %v4185_v18 }
 0x96b   :  { %v2116_v26 = vpop.xlane.xlu0 %2115  ;;  %v2118_v41 = vpop.xlane.xlu1 %2117  ;;  %2983 = vmatpush3.bf16.xpose.msra.mxu0 %v2157_v55  ;;  %v1696_v44 = vmul.f32 %v3283_v54, %v4187_v40 }
 0x96c   :  { %3292 = vrcp.f32 %v2116_v26  ;;  %2984 = vmatprep.subr.bf16.mxu0 %v3297_v12 }
 0x96d   :  { %3294 = vrcp.f32 %v2118_v41  ;;  %v3285_v28 = vpop.eup %3284  ;;  %v1706_v10 = vpack.c.bf16 %v1696_v44, %v1695_v31 }
 0x96e   :  { %v3287_v27 = vpop.eup %3286  ;;  %v2147_v45 = vmul.f32 %v3285_v28, %v4191_v22 }
 0x96f   :  { %2939 = vmatpush3.bf16.xpose.msra.mxu1 %v1706_v10  ;;  %v2148_v47 = vmul.f32 %v3287_v27, %v4193_v49 }
 0x970   :  { %2940 = vmatprep.subr.bf16.mxu1 %v3297_v12 }
 0x971   :  { %v3289_v32 = vpop.eup %3288  ;;  %v2158_v52 = vpack.c.bf16 %v2148_v47, %v2147_v45 }
 0x972   :  { %v3291_v18 = vpop.eup %3290  ;;  %v1697_v16 = vmul.f32 %v3289_v32, %v4197_v8  ;;  %v1699_v8 = vpack.c.bf16 %v3478_v59, %v3478_v59 }
 0x973   :  { %2985 = vmatpush3.bf16.xpose.msra.mxu0 %v2158_v52  ;;  %v1698_v40 = vmul.f32 %v3291_v18, %v4199_v60  ;;  %v3038_v60 = vld [vmem:[%s4320_s5] sm:$0xff]   ;;  %v2218_v20 = vpop.permute.xlu0 %2217 }
 0x974   :  { %2986 = vmatprep.subr.bf16.mxu0 %v3297_v12  ;;  %v2151_v12 = vpack.c.bf16 %v3482_v61, %v3482_v61  ;;  %v3039_v61 = vld [vmem:[%s4320_s5 + $0x8] sm:$0xff]  }
 0x975   :  { %v1707_v13 = vpack.c.bf16 %v1698_v40, %v1697_v16 }
 0x976   :  { %v3293_v17 = vpop.eup %3292 }
 0x977   :  { %v3295_v11 = vpop.eup %3294  ;;  %v2149_v22 = vmul.f32 %v3293_v17, %v4205_v34  ;;  %2941 = vmatpush3.bf16.xpose.msra.mxu1 %v1707_v13 }
 0x978   :  { %v2150_v49 = vmul.f32 %v3295_v11, %v4203_v6  ;;  %2992 = vmatprep.subr.bf16.mxu1 %v3905_v1 }
 0x97a   :  { %v2159_v38 = vpack.c.bf16 %v2150_v49, %v2149_v22 }
 0x97c   :  { %2987 = vmatpush3.bf16.xpose.msra.mxu0 %v2159_v38 }
 0x97e   :  { %2943 = vmatmul.mubr.bf16.vlgmr.msra.gmra.mrb[52].mxu1 %v1699_v8 }
 0x97f   :  { %2993 = vmatpush3.bf16.msra.mxu1 %v3905_v1  ;;  %2996 = vmatprep.mubr.msk.bf16.mxu1 %vm241_vm1, %v3038_v60  ;;  %v2223_v1 = vpop.permute.xlu1 %2222 }
 0x983   :  { %2989 = vmatmul.mubr.bf16.vlgmr.msra.gmra.mrb[32].mxu0 %v2151_v12  ;;  %v2228_v29 = vpop.permute.xlu1 %2227 }
 0x987   :  { %v2233_v19 = vpop.permute.xlu1 %2232 }
 0xa51   :  { %v1742_v6 = vpop.f32.mrb[52].mxu1 }
 0xa52   :  { %v2944_v34 = vpop.f32.mrb[53].mxu1 }
 0xa53   :  { %v1745_v2 = vpop.f32.mrb[54].mxu1 }
 0xa54   :  { %v2945_v58 = vpop.f32.mrb[55].mxu1 }
 0xa56   :  { %v2194_v15 = vpop.f32.mrb[32].mxu0 }
 0xa57   :  { %v2210_v14 = vpack.c.bf16 %v2194_v15, %v1742_v6  ;;  %v2990_v59 = vpop.f32.mrb[33].mxu0 }
 0xa58   :  { %v2197_v56 = vpop.f32.mrb[34].mxu0 }
 0xa59   :  { %v2991_v3 = vpop.f32.mrb[35].mxu0  ;;  %2994 = vmatprep.subr.bf16.mxu1 %v2210_v14 }
 0xa5a   :  { %2995 = vmatpush3.bf16.msra.mxu1 %v2210_v14 }
 0xa5d   :  { %2997 = vmatmul.mubr.msk.bf16.vlgmr.msra.gmra.mrb[56].mxu1 %vm241_vm1, %v3039_v61 }
 0xb30   :  { %v2998_v46 = vpop.f32.mrb[56].mxu1 }
 0xb31   :  { %v2294_v36 = vadd.f32 %v2998_v46, %v2228_v29  ;;  %v2285_v5 = vpop.f32.mrb[57].mxu1 }
 0xb32   :  { %v2286_v53 = vadd.f32 %v2285_v5, %v2218_v20  ;;  %v2999_v35 = vpop.f32.mrb[58].mxu1 }
 0xb33   :  { %v2302_v4 = vmax.f32 %v2294_v36, 0.0  ;;  %v2297_v50 = vadd.f32 %v2999_v35, %v2233_v19  ;;  %v2288_v39 = vpop.f32.mrb[59].mxu1 }
 0xb34   :  { %v2300_v57 = vmax.f32 %v2286_v53, 0.0  ;;  %v2289_v23 = vadd.f32 %v2288_v39, %v2223_v1 }
 0xb35   :  { %2307 = vst.msk [vmem:[%s4321_s8 + $0x10] sm:$0xff] %vm2304_vm4, %v2302_v4  ;;  %v2303_v62 = vmax.f32 %v2297_v50, 0.0 }
 0xb36   :  { %2305 = vst.msk [vmem:[%s4321_s8] sm:$0xff] %vm2304_vm4, %v2300_v57  ;;  %v2301_v25 = vmax.f32 %v2289_v23, 0.0  ;;  %2313 = vrot.lane.b32.xlu0 %v2300_v57, %s3299_s19 }
 0xb37   :  { %2308 = vst.msk [vmem:[%s4321_s8 + $0x18] sm:$0xff] %vm2304_vm4, %v2303_v62 }
 0xb38   :  { %2306 = vst.msk [vmem:[%s4321_s8 + $0x8] sm:$0xff] %vm2304_vm4, %v2301_v25  ;;  %2315 = vrot.lane.b32.xlu1 %v2301_v25, %s3299_s19 }
 0xb3a   :  { %2317 = vrot.lane.b32.xlu0 %v2302_v4, %s3299_s19 }
 0xb3c   :  { %2319 = vrot.lane.b32.xlu1 %v2303_v62, %s3299_s19 }
 0xba8   :  { %v2314_v21 = vpop.permute.xlu0 %2313 }
 0xba9   :  { %2474 = vst.msk [vmem:[%s4321_s8 + $0x20] sm:$0xff] %vm2304_vm4, %v2314_v21 }
 0xbaa   :  { %v2316_v0 = vpop.permute.xlu1 %2315 }
 0xbab   :  { %2475 = vst.msk [vmem:[%s4321_s8 + $0x28] sm:$0xff] %vm2304_vm4, %v2316_v0 }
 0xbac   :  { %v2318_v63 = vpop.permute.xlu0 %2317 }
 0xbad   :  { %2476 = vst.msk [vmem:[%s4321_s8 + $0x30] sm:$0xff] %vm2304_vm4, %v2318_v63 }
 0xbae   :  { %v2320_v24 = vpop.permute.xlu1 %2319 }
 0xbaf   :  { %2477 = vst.msk [vmem:[%s4321_s8 + $0x38] sm:$0xff] %vm2304_vm4, %v2320_v24 }

</bundles_post_ra>
